<compile_context>
chip_gen: v5e
topology: v5e:2x2
jax: 0.10.0
libtpu: 0.0.40
codegen_flags: <defaults>
</compile_context>

<pallas_src>
import functools

import jax
import jax.numpy as jnp
from jax.experimental import pallas as pl
from jax.experimental.pallas import tpu as pltpu


# ----------------------------------------------------------------------------
# In-kernel math helpers (all f32 on the VPU)
# ----------------------------------------------------------------------------
def _layernorm(x, gamma, beta):
    mu = jnp.mean(x, axis=-1, keepdims=True)
    var = jnp.mean(jnp.square(x - mu), axis=-1, keepdims=True)
    return (x - mu) * jax.lax.rsqrt(var + 1e-5) * gamma + beta  # PyTorch eps


def _gelu_exact(x):
    # PyTorch nn.GELU() default: 0.5 * x * (1 + erf(x / sqrt(2)))
    return 0.5 * x * (1.0 + jax.lax.erf(x * (2.0 ** -0.5)))


# ----------------------------------------------------------------------------
# Fused whole-model kernel.  grid = (num_batch_blocks,)   ["parallel"]
# Activations for one batch block stay resident in a (B_blk*n, D) VMEM scratch
# across the in-kernel depth loop; all weights use constant index_maps so they
# are DMA'd once and stay VMEM-resident for the whole grid.
# ----------------------------------------------------------------------------
def _cot_kernel(x_ref, ln_ref, qkvw_ref, outw_ref, outb_ref,
                ff1w_ref, ff1b_ref, ff2w_ref, ff2b_ref,
                hlng_ref, hlnb_ref, headw_ref, headb_ref,
                o_ref, x_vmem, *, depth, b_blk, n_tok, heads, dim_head):
    inner = heads * dim_head

    # Activations for this batch block (already embedded + pos + cls).
    x_vmem[...] = x_ref[...]

    @pl.loop(0, depth)
    def _layer(layer):
        x = x_vmem[...]                                     # (b_blk*n, D) f32
        lnp = ln_ref[layer]                                 # (4, D): g1,b1,g2,b2
        g1, b1 = lnp[0:1, :], lnp[1:2, :]
        g2, b2 = lnp[2:3, :], lnp[3:4, :]

        # ---- PreNorm + shared multi-head attention, residual ----
        h = _layernorm(x, g1, b1)
        # qkv GEMM over the whole (b_blk*n, D) slab.  1/sqrt(dh) is pre-folded
        # into the q-columns of qkvw at trace time; to_qkv has no bias.
        qkv = jnp.dot(h.astype(jnp.bfloat16), qkvw_ref[...],
                      preferred_element_type=jnp.float32)   # (b_blk*n, 3*inner)

        # Per-head attention; the head concat is folded into the out-proj:
        #   att_ctx += O_h @ out_w[h*dh:(h+1)*dh, :]   (aligned weight slices)
        att_ctx = None
        for hh in range(heads):
            c0 = hh * dim_head
            o_rows = []
            for bi in range(b_blk):                         # batches never mix
                r0 = bi * n_tok
                q = qkv[r0:r0 + n_tok, c0:c0 + dim_head]
                k = qkv[r0:r0 + n_tok, inner + c0:inner + c0 + dim_head]
                v = qkv[r0:r0 + n_tok,
                        2 * inner + c0:2 * inner + c0 + dim_head]
                s = jnp.dot(q, k.T, preferred_element_type=jnp.float32)  # (n,n)
                s = s - jnp.max(s, axis=-1, keepdims=True)
                p = jnp.exp(s)
                p = p * pl.reciprocal(jnp.sum(p, axis=-1, keepdims=True),
                                      approx=True)
                o_rows.append(jnp.dot(p, v, preferred_element_type=jnp.float32))
            o_h = o_rows[0] if b_blk == 1 else jnp.concatenate(o_rows, axis=0)
            contrib = jnp.dot(o_h.astype(jnp.bfloat16),
                              outw_ref[c0:c0 + dim_head, :],
                              preferred_element_type=jnp.float32)        # (M, D)
            att_ctx = contrib if att_ctx is None else att_ctx + contrib
        x = x + att_ctx + outb_ref[...]

        # ---- PreNorm + shared feed-forward, residual ----
        h2 = _layernorm(x, g2, b2)
        h2 = jnp.dot(h2.astype(jnp.bfloat16), ff1w_ref[...],
                     preferred_element_type=jnp.float32) + ff1b_ref[...]
        h2 = _gelu_exact(h2)
        h2 = jnp.dot(h2.astype(jnp.bfloat16), ff2w_ref[...],
                     preferred_element_type=jnp.float32) + ff2b_ref[...]
        x_vmem[...] = x + h2

    # ---- cls pool + LayerNorm + Linear head; one lane-dense block store ----
    x = x_vmem[...]
    if b_blk == 1:
        cls = x[0:1, :]
    else:
        cls = jnp.concatenate(
            [x[bi * n_tok:bi * n_tok + 1, :] for bi in range(b_blk)], axis=0)
    hc = _layernorm(cls, hlng_ref[...], hlnb_ref[...])
    o_ref[...] = (jnp.dot(hc.astype(jnp.bfloat16), headw_ref[...],
                          preferred_element_type=jnp.float32)
                  + headb_ref[...]).astype(o_ref.dtype)


# ----------------------------------------------------------------------------
# Batch-block sizing
# ----------------------------------------------------------------------------
def _pick_batch_block(b, n_tok):
    """Choose (B_blk, num_blocks).

    Targets ~128-256 activation rows (B_blk*n) per block for MXU fill on all
    generations.  When the batch is split, B_blk is a multiple of 8 so both
    the (B_blk*n, D) activation block and the (B_blk, out_dim) output block
    stay tile-aligned, and >=2 blocks are kept so v7x's two TensorCores both
    get work.  The batch is zero-padded up to B_blk*num_blocks; padded rows
    never mix with real rows and are dropped after the call.
    """
    cap = max(8, (256 // max(n_tok, 1)) // 8 * 8)
    if b <= cap:
        return b, 1                       # single block == full array
    blk = min(cap, max(8, ((b + 1) // 2) // 8 * 8))
    return blk, -(-b // blk)


# ----------------------------------------------------------------------------
# Model: parameters + forward
# ----------------------------------------------------------------------------
def init_params(key, cfg):
    D = cfg["embed_dim"]
    Ein = cfg["input_embed_size"]
    P = cfg["input_patch_size"]
    H, dh = cfg["heads"], cfg["dim_head"]
    inner = H * dh
    mlp = cfg["mlp_dim"]
    out_dim = cfg["output_dim"]
    depth = cfg["depth"]
    f = cfg["input_size"] // P

    ks = jax.random.split(key, 24)

    def nrm(k, shape, s=0.02):
        return s * jax.random.normal(k, shape, jnp.float32)

    return {
        # input embedding Linear(1, Ein)
        "in_w": nrm(ks[0], (1, Ein), 0.5),
        "in_b": nrm(ks[1], (1, Ein), 0.1),
        # patch embedding Linear(P*Ein, D)
        "patch_w": nrm(ks[2], (P * Ein, D)),
        "patch_b": nrm(ks[3], (1, D), 0.02),
        "pos_emb": nrm(ks[4], (1, f, D), 1.0),
        "cls_tok": nrm(ks[5], (1, 1, D), 1.0),
        # shared attention weights (to_qkv has NO bias)
        "qkv_w": nrm(ks[6], (D, 3 * inner)),
        "out_w": nrm(ks[7], (inner, D)),
        "out_b": nrm(ks[8], (1, D), 0.02),
        # shared feed-forward weights
        "ff1_w": nrm(ks[9], (D, mlp)),
        "ff1_b": nrm(ks[10], (1, mlp), 0.02),
        "ff2_w": nrm(ks[11], (mlp, D)),
        "ff2_b": nrm(ks[12], (1, D), 0.02),
        # head
        "head_ln_g": 1.0 + nrm(ks[13], (1, D), 0.05),
        "head_ln_b": nrm(ks[14], (1, D), 0.05),
        "head_w": nrm(ks[15], (D, out_dim)),
        "head_b": nrm(ks[16], (1, out_dim), 0.02),
        # per-depth-layer PreNorm LayerNorms (stacked over depth)
        "ln1_g": 1.0 + nrm(ks[17], (depth, 1, D), 0.05),
        "ln1_b": nrm(ks[18], (depth, 1, D), 0.05),
        "ln2_g": 1.0 + nrm(ks[19], (depth, 1, D), 0.05),
        "ln2_b": nrm(ks[20], (depth, 1, D), 0.05),
    }


def cot_forward(context, params, cfg):
    b, L = context.shape
    P = cfg["input_patch_size"]
    Ein = cfg["input_embed_size"]
    D = cfg["embed_dim"]
    H, dh = cfg["heads"], cfg["dim_head"]
    inner = H * dh
    mlp = cfg["mlp_dim"]
    out_dim = cfg["output_dim"]
    depth = cfg["depth"]
    f = L // P
    n = f + 1
    scale = dh ** (-0.5)

    # --------------- trace-time algebraic folds (tiny XLA ops) --------------
    # Linear(1,Ein) + rearrange + Linear(P*Ein, D)  ==  xp @ W_eff + b_eff
    w_eff = jnp.einsum("e,ped->pd", params["in_w"][0],
                       params["patch_w"].reshape(P, Ein, D))            # (P, D)
    b_eff = jnp.tile(params["in_b"], (1, P)) @ params["patch_w"] + params["patch_b"]
    # fold 1/sqrt(dh) into the q-columns of the qkv weight
    qscale = jnp.concatenate([jnp.full((1, inner), scale, jnp.float32),
                              jnp.ones((1, 2 * inner), jnp.float32)], axis=1)
    # bf16 MXU operands (accumulation stays f32 inside the kernel)
    qkv_w = (params["qkv_w"] * qscale).astype(jnp.bfloat16)
    out_w = params["out_w"].astype(jnp.bfloat16)
    ff1_w = params["ff1_w"].astype(jnp.bfloat16)
    ff2_w = params["ff2_w"].astype(jnp.bfloat16)
    head_w = params["head_w"].astype(jnp.bfloat16)

    # pack per-layer LayerNorm params: (depth, 4, D) rows = [g1, b1, g2, b2]
    ln_params = jnp.concatenate([params["ln1_g"], params["ln1_b"],
                                 params["ln2_g"], params["ln2_b"]], axis=1)

    # ---- embedding + pos + cls prepend in the wrapper (one tiny XLA GEMM) --
    xp = context.reshape(b, f, P)
    y = jnp.einsum("bfp,pd->bfd", xp, w_eff) + b_eff + params["pos_emb"]
    cls = jnp.broadcast_to(params["cls_tok"], (b, 1, D))
    x0 = jnp.concatenate([cls, y], axis=1)                              # (b, n, D)

    # ---- batch blocking (padded rows never mix & are dropped at the end) ---
    B_blk, num_blocks = _pick_batch_block(b, n)
    b_pad = B_blk * num_blocks
    if b_pad != b:
        x0 = jnp.concatenate(
            [x0, jnp.zeros((b_pad - b, n, D), x0.dtype)], axis=0)
    x0_flat = x0.reshape(b_pad * n, D)

    kernel = functools.partial(_cot_kernel, depth=depth, b_blk=B_blk,
                               n_tok=n, heads=H, dim_head=dh)
    const2 = lambda i: (0, 0)
    const3 = lambda i: (0, 0, 0)

    out = pl.pallas_call(
        kernel,
        grid=(num_blocks,),
        in_specs=[
            pl.BlockSpec((B_blk * n, D), lambda i: (i, 0)),     # activations
            pl.BlockSpec((depth, 4, D), const3),                # LN params (resident)
            pl.BlockSpec((D, 3 * inner), const2),               # qkv_w   (resident)
            pl.BlockSpec((inner, D), const2),                   # out_w
            pl.BlockSpec((1, D), const2),                       # out_b
            pl.BlockSpec((D, mlp), const2),                     # ff1_w
            pl.BlockSpec((1, mlp), const2),                     # ff1_b
            pl.BlockSpec((mlp, D), const2),                     # ff2_w
            pl.BlockSpec((1, D), const2),                       # ff2_b
            pl.BlockSpec((1, D), const2),                       # head_ln_g
            pl.BlockSpec((1, D), const2),                       # head_ln_b
            pl.BlockSpec((D, out_dim), const2),                 # head_w
            pl.BlockSpec((1, out_dim), const2),                 # head_b
        ],
        out_specs=pl.BlockSpec((B_blk, out_dim), lambda i: (i, 0)),
        out_shape=jax.ShapeDtypeStruct((b_pad, out_dim), jnp.float32),
        scratch_shapes=[pltpu.VMEM((B_blk * n, D), jnp.float32)],  # resident acts
        compiler_params=pltpu.CompilerParams(
            dimension_semantics=("parallel",)),
    )(x0_flat, ln_params, qkv_w, out_w, params["out_b"],
      ff1_w, params["ff1_b"], ff2_w, params["ff2_b"],
      params["head_ln_g"], params["head_ln_b"], head_w, params["head_b"])

    return out[:b]                                            # (b, output_dim)


# ----------------------------------------------------------------------------
# Plain-JAX f32 reference (direct transcription of the PyTorch module) used as
# correctness check of the fused kernel + algebraic folds.
# ----------------------------------------------------------------------------
def cot_reference(context, params, cfg):
    b, L = context.shape
    P = cfg["input_patch_size"]
    D = cfg["embed_dim"]
    H, dh = cfg["heads"], cfg["dim_head"]
    f = L // P
    scale = dh ** (-0.5)

    def ln(v, g, bb):
        mu = v.mean(-1, keepdims=True)
        var = ((v - mu) ** 2).mean(-1, keepdims=True)
        return (v - mu) / jnp.sqrt(var + 1e-5) * g + bb

    x = context[..., None] * params["in_w"][0] + params["in_b"][0]      # (b, L, Ein)
    x = x.reshape(b, f, P * cfg["input_embed_size"])
    x = x @ params["patch_w"] + params["patch_b"][0]                    # (b, f, D)
    x = x + params["pos_emb"]
    cls = jnp.broadcast_to(params["cls_tok"], (b, 1, D))
    x = jnp.concatenate([cls, x], axis=1)                               # (b, n, D)

    for d_idx in range(cfg["depth"]):
        h = ln(x, params["ln1_g"][d_idx, 0], params["ln1_b"][d_idx, 0])
        qkv = h @ params["qkv_w"]
        q, k, v = jnp.split(qkv, 3, axis=-1)
        q = q.reshape(b, -1, H, dh).transpose(0, 2, 1, 3)
        k = k.reshape(b, -1, H, dh).transpose(0, 2, 1, 3)
        v = v.reshape(b, -1, H, dh).transpose(0, 2, 1, 3)
        s = jnp.einsum("bhqd,bhkd->bhqk", q, k) * scale
        p = jax.nn.softmax(s, axis=-1)
        o = jnp.einsum("bhqk,bhkd->bhqd", p, v)
        o = o.transpose(0, 2, 1, 3).reshape(b, -1, H * dh)
        x = x + (o @ params["out_w"] + params["out_b"][0])
        h2 = ln(x, params["ln2_g"][d_idx, 0], params["ln2_b"][d_idx, 0])
        h2 = h2 @ params["ff1_w"] + params["ff1_b"][0]
        h2 = 0.5 * h2 * (1.0 + jax.lax.erf(h2 * (2.0 ** -0.5)))
        x = x + (h2 @ params["ff2_w"] + params["ff2_b"][0])

    xc = x[:, 0]
    xc = ln(xc, params["head_ln_g"][0], params["head_ln_b"][0])
    return xc @ params["head_w"] + params["head_b"][0]


# ----------------------------------------------------------------------------
if __name__ == "__main__":
    cfg = dict(
        input_size=32,
        input_embed_size=8,
        input_patch_size=4,
        output_dim=16,
        embed_dim=128,
        depth=2,            # contextual_depth
        heads=4,
        dim_head=32,
        mlp_dim=256,
    )

    key = jax.random.PRNGKey(0)
    pkey, xkey = jax.random.split(key)
    params = init_params(pkey, cfg)
    context = jax.random.normal(xkey, (2, cfg["input_size"]), jnp.float32)

    fwd = jax.jit(functools.partial(cot_forward, cfg=cfg))
    out = jax.block_until_ready(fwd(context, params))

    assert out.shape == (2, cfg["output_dim"])
    assert bool(jnp.all(jnp.isfinite(out)))

    # Numerical check against the straight-line f32 JAX transcription.  The
    # kernel uses bf16 MXU operands (f32 accumulation) + approx softmax
    # reciprocal, so the tolerance is looser than a pure-f32 variant.
    ref = cot_reference(context, params, cfg)
    max_err = float(jnp.max(jnp.abs(out - ref)))
    ref_scale = float(jnp.max(jnp.abs(ref)))
    assert max_err <= 0.05 * max(ref_scale, 1.0), (
        f"kernel/reference mismatch: abs_err={max_err}, ref_scale={ref_scale}")

    print("KERNEL_OK")
</pallas_src>

<mosaic_0001>
module attributes {stable_mosaic.version = 11 : i64} {
  func.func @_cot_kernel(%arg0: i32, %arg1: memref<18x128xf32, #tpu.memory_space<vmem>>, %arg2: memref<2x4x128xf32, #tpu.memory_space<vmem>>, %arg3: memref<128x384xbf16, #tpu.memory_space<vmem>>, %arg4: memref<128x128xbf16, #tpu.memory_space<vmem>>, %arg5: memref<1x128xf32, #tpu.memory_space<vmem>>, %arg6: memref<128x256xbf16, #tpu.memory_space<vmem>>, %arg7: memref<1x256xf32, #tpu.memory_space<vmem>>, %arg8: memref<256x128xbf16, #tpu.memory_space<vmem>>, %arg9: memref<1x128xf32, #tpu.memory_space<vmem>>, %arg10: memref<1x128xf32, #tpu.memory_space<vmem>>, %arg11: memref<1x128xf32, #tpu.memory_space<vmem>>, %arg12: memref<128x16xbf16, #tpu.memory_space<vmem>>, %arg13: memref<1x16xf32, #tpu.memory_space<vmem>>, %arg14: memref<2x16xf32, #tpu.memory_space<vmem>>, %arg15: memref<18x128xf32, #tpu.memory_space<vmem>>) attributes {dimension_semantics = [#tpu.dimension_semantics<parallel>], iteration_bounds = array<i64: 1>, scalar_prefetch = 0 : i64, scratch_operands = 1 : i64, tpu.core_type = #tpu.core_type<tc>, window_params = [{transform_indices = @transform_0, window_bounds = array<i64: 18, 128>}, {pipeline_mode = #tpu.pipeline_mode<synchronous>, transform_indices = @transform_1, window_bounds = array<i64: 2, 4, 128>}, {pipeline_mode = #tpu.pipeline_mode<synchronous>, transform_indices = @transform_2, window_bounds = array<i64: 128, 384>}, {pipeline_mode = #tpu.pipeline_mode<synchronous>, transform_indices = @transform_3, window_bounds = array<i64: 128, 128>}, {pipeline_mode = #tpu.pipeline_mode<synchronous>, transform_indices = @transform_4, window_bounds = array<i64: 1, 128>}, {pipeline_mode = #tpu.pipeline_mode<synchronous>, transform_indices = @transform_5, window_bounds = array<i64: 128, 256>}, {pipeline_mode = #tpu.pipeline_mode<synchronous>, transform_indices = @transform_6, window_bounds = array<i64: 1, 256>}, {pipeline_mode = #tpu.pipeline_mode<synchronous>, transform_indices = @transform_7, window_bounds = array<i64: 256, 128>}, {pipeline_mode = #tpu.pipeline_mode<synchronous>, transform_indices = @transform_8, window_bounds = array<i64: 1, 128>}, {pipeline_mode = #tpu.pipeline_mode<synchronous>, transform_indices = @transform_9, window_bounds = array<i64: 1, 128>}, {pipeline_mode = #tpu.pipeline_mode<synchronous>, transform_indices = @transform_10, window_bounds = array<i64: 1, 128>}, {pipeline_mode = #tpu.pipeline_mode<synchronous>, transform_indices = @transform_11, window_bounds = array<i64: 128, 16>}, {pipeline_mode = #tpu.pipeline_mode<synchronous>, transform_indices = @transform_12, window_bounds = array<i64: 1, 16>}, {transform_indices = @transform_13, window_bounds = array<i64: 2, 16>}]} {
    %c0 = arith.constant 0 : index
    %c0_0 = arith.constant 0 : index
    %0 = vector.load %arg1[%c0, %c0_0] : memref<18x128xf32, #tpu.memory_space<vmem>>, vector<18x128xf32>
    %c0_1 = arith.constant 0 : index
    %c0_2 = arith.constant 0 : index
    %1 = vector.load %arg15[%c0_1, %c0_2] : memref<18x128xf32, #tpu.memory_space<vmem>>, vector<18x128xf32>
    tpu.vector_store %arg15[%c0_1, %c0_2], %0 {strides = array<i32>} : memref<18x128xf32, #tpu.memory_space<vmem>>, vector<18x128xf32>,
    %c0_i32 = arith.constant 0 : i32
    %c2_i32 = arith.constant 2 : i32
    %2 = arith.addi %c0_i32, %c2_i32 : i32
    %c1_i32 = arith.constant 1 : i32
    scf.for %arg16 = %c0_i32 to %2 step %c1_i32  : i32 {
      %c1_i32_21 = arith.constant 1 : i32
      %38 = arith.muli %arg16, %c1_i32_21 : i32
      %c0_i32_22 = arith.constant 0 : i32
      %39 = arith.addi %c0_i32_22, %38 : i32
      %c0_23 = arith.constant 0 : index
      %c0_24 = arith.constant 0 : index
      %40 = vector.load %arg15[%c0_23, %c0_24] : memref<18x128xf32, #tpu.memory_space<vmem>>, vector<18x128xf32>
      %41 = arith.index_cast %39 : i32 to index
      %c0_25 = arith.constant 0 : index
      %c0_26 = arith.constant 0 : index
      %42 = vector.load %arg2[%41, %c0_25, %c0_26] : memref<2x4x128xf32, #tpu.memory_space<vmem>>, vector<1x4x128xf32>
      %43 = vector.shape_cast %42 : vector<1x4x128xf32> to vector<4x128xf32>
      %44 = vector.extract_strided_slice %43 {offsets = [0, 0], sizes = [1, 128], strides = [1, 1]} : vector<4x128xf32> to vector<1x128xf32>
      %45 = vector.extract_strided_slice %43 {offsets = [1, 0], sizes = [1, 128], strides = [1, 1]} : vector<4x128xf32> to vector<1x128xf32>
      %46 = vector.extract_strided_slice %43 {offsets = [2, 0], sizes = [1, 128], strides = [1, 1]} : vector<4x128xf32> to vector<1x128xf32>
      %47 = vector.extract_strided_slice %43 {offsets = [3, 0], sizes = [1, 128], strides = [1, 1]} : vector<4x128xf32> to vector<1x128xf32>
      %cst_27 = arith.constant dense<0.000000e+00> : vector<18xf32>
      %48 = vector.multi_reduction <add>, %40, %cst_27 [1] : vector<18x128xf32> to vector<18xf32>
      %49 = vector.shape_cast %48 : vector<18xf32> to vector<18x1xf32>
      %cst_28 = arith.constant 1.280000e+02 : f32
      %50 = vector.broadcast %cst_28 : f32 to vector<18x1xf32>
      %51 = arith.divf %49, %50 : vector<18x1xf32>
      %52 = vector.broadcast %51 : vector<18x1xf32> to vector<18x128xf32>
      %53 = arith.subf %40, %52 : vector<18x128xf32>
      %54 = arith.mulf %53, %53 : vector<18x128xf32>
      %cst_29 = arith.constant dense<0.000000e+00> : vector<18xf32>
      %55 = vector.multi_reduction <add>, %54, %cst_29 [1] : vector<18x128xf32> to vector<18xf32>
      %56 = vector.shape_cast %55 : vector<18xf32> to vector<18x1xf32>
      %cst_30 = arith.constant 1.280000e+02 : f32
      %57 = vector.broadcast %cst_30 : f32 to vector<18x1xf32>
      %58 = arith.divf %56, %57 : vector<18x1xf32>
      %59 = vector.broadcast %51 : vector<18x1xf32> to vector<18x128xf32>
      %60 = arith.subf %40, %59 : vector<18x128xf32>
      %cst_31 = arith.constant 9.99999974E-6 : f32
      %61 = vector.broadcast %cst_31 : f32 to vector<18x1xf32>
      %62 = arith.addf %58, %61 : vector<18x1xf32>
      %63 = math.rsqrt %62 : vector<18x1xf32>
      %64 = vector.broadcast %63 : vector<18x1xf32> to vector<18x128xf32>
      %65 = arith.mulf %60, %64 : vector<18x128xf32>
      %66 = vector.broadcast %44 : vector<1x128xf32> to vector<18x128xf32>
      %67 = arith.mulf %65, %66 : vector<18x128xf32>
      %68 = vector.broadcast %45 : vector<1x128xf32> to vector<18x128xf32>
      %69 = arith.addf %67, %68 : vector<18x128xf32>
      %70 = arith.truncf %69 : vector<18x128xf32> to vector<18x128xbf16>
      %c0_32 = arith.constant 0 : index
      %c0_33 = arith.constant 0 : index
      %71 = vector.load %arg3[%c0_32, %c0_33] : memref<128x384xbf16, #tpu.memory_space<vmem>>, vector<128x384xbf16>
      %cst_34 = arith.constant dense<0.000000e+00> : vector<18x384xf32>
      %72 = tpu.matmul %70, %71, %cst_34 {dimension_numbers = #tpu.dot_dimension_numbers<[1], [0], [0], [1], [0, 0, 1, 1], [], []>} : vector<18x128xbf16>, vector<128x384xbf16>, vector<18x384xf32> -> vector<18x384xf32>
      %73 = vector.extract_strided_slice %72 {offsets = [0, 0], sizes = [9, 32], strides = [1, 1]} : vector<18x384xf32> to vector<9x32xf32>
      %74 = vector.extract_strided_slice %72 {offsets = [0, 128], sizes = [9, 32], strides = [1, 1]} : vector<18x384xf32> to vector<9x32xf32>
      %75 = vector.extract_strided_slice %72 {offsets = [0, 256], sizes = [9, 32], strides = [1, 1]} : vector<18x384xf32> to vector<9x32xf32>
      %76 = tpu.transpose %74, [1, 0] : vector<9x32xf32> -> vector<32x9xf32>
      %cst_35 = arith.constant dense<0.000000e+00> : vector<9x9xf32>
      %77 = tpu.matmul %73, %76, %cst_35 {dimension_numbers = #tpu.dot_dimension_numbers<[1], [0], [0], [1], [0, 0, 1, 1], [], []>} : vector<9x32xf32>, vector<32x9xf32>, vector<9x9xf32> -> vector<9x9xf32>
      %cst_36 = arith.constant dense<0xFF800000> : vector<9xf32>
      %78 = vector.multi_reduction <maximumf>, %77, %cst_36 [1] : vector<9x9xf32> to vector<9xf32>
      %79 = vector.shape_cast %78 : vector<9xf32> to vector<9x1xf32>
      %80 = vector.broadcast %79 : vector<9x1xf32> to vector<9x9xf32>
      %81 = arith.subf %77, %80 : vector<9x9xf32>
      %82 = math.exp %81 : vector<9x9xf32>
      %cst_37 = arith.constant dense<0.000000e+00> : vector<9xf32>
      %83 = vector.multi_reduction <add>, %82, %cst_37 [1] : vector<9x9xf32> to vector<9xf32>
      %84 = vector.shape_cast %83 : vector<9xf32> to vector<9x1xf32>
      %85 = tpu.reciprocal %84 {approx = true} : vector<9x1xf32> -> vector<9x1xf32>
      %86 = vector.broadcast %85 : vector<9x1xf32> to vector<9x9xf32>
      %87 = arith.mulf %82, %86 : vector<9x9xf32>
      %cst_38 = arith.constant dense<0.000000e+00> : vector<9x32xf32>
      %88 = tpu.matmul %87, %75, %cst_38 {dimension_numbers = #tpu.dot_dimension_numbers<[1], [0], [0], [1], [0, 0, 1, 1], [], []>} : vector<9x9xf32>, vector<9x32xf32>, vector<9x32xf32> -> vector<9x32xf32>
      %89 = vector.extract_strided_slice %72 {offsets = [9, 0], sizes = [9, 32], strides = [1, 1]} : vector<18x384xf32> to vector<9x32xf32>
      %90 = vector.extract_strided_slice %72 {offsets = [9, 128], sizes = [9, 32], strides = [1, 1]} : vector<18x384xf32> to vector<9x32xf32>
      %91 = vector.extract_strided_slice %72 {offsets = [9, 256], sizes = [9, 32], strides = [1, 1]} : vector<18x384xf32> to vector<9x32xf32>
      %92 = tpu.transpose %90, [1, 0] : vector<9x32xf32> -> vector<32x9xf32>
      %cst_39 = arith.constant dense<0.000000e+00> : vector<9x9xf32>
      %93 = tpu.matmul %89, %92, %cst_39 {dimension_numbers = #tpu.dot_dimension_numbers<[1], [0], [0], [1], [0, 0, 1, 1], [], []>} : vector<9x32xf32>, vector<32x9xf32>, vector<9x9xf32> -> vector<9x9xf32>
      %cst_40 = arith.constant dense<0xFF800000> : vector<9xf32>
      %94 = vector.multi_reduction <maximumf>, %93, %cst_40 [1] : vector<9x9xf32> to vector<9xf32>
      %95 = vector.shape_cast %94 : vector<9xf32> to vector<9x1xf32>
      %96 = vector.broadcast %95 : vector<9x1xf32> to vector<9x9xf32>
      %97 = arith.subf %93, %96 : vector<9x9xf32>
      %98 = math.exp %97 : vector<9x9xf32>
      %cst_41 = arith.constant dense<0.000000e+00> : vector<9xf32>
      %99 = vector.multi_reduction <add>, %98, %cst_41 [1] : vector<9x9xf32> to vector<9xf32>
      %100 = vector.shape_cast %99 : vector<9xf32> to vector<9x1xf32>
      %101 = tpu.reciprocal %100 {approx = true} : vector<9x1xf32> -> vector<9x1xf32>
      %102 = vector.broadcast %101 : vector<9x1xf32> to vector<9x9xf32>
      %103 = arith.mulf %98, %102 : vector<9x9xf32>
      %cst_42 = arith.constant dense<0.000000e+00> : vector<9x32xf32>
      %104 = tpu.matmul %103, %91, %cst_42 {dimension_numbers = #tpu.dot_dimension_numbers<[1], [0], [0], [1], [0, 0, 1, 1], [], []>} : vector<9x9xf32>, vector<9x32xf32>, vector<9x32xf32> -> vector<9x32xf32>
      %105 = tpu.concatenate %88, %104 in 0 : vector<9x32xf32>, vector<9x32xf32> -> vector<18x32xf32>
      %106 = arith.truncf %105 : vector<18x32xf32> to vector<18x32xbf16>
      %c0_43 = arith.constant 0 : index
      %c0_44 = arith.constant 0 : index
      %107 = vector.load %arg4[%c0_43, %c0_44] : memref<128x128xbf16, #tpu.memory_space<vmem>>, vector<32x128xbf16>
      %cst_45 = arith.constant dense<0.000000e+00> : vector<18x128xf32>
      %108 = tpu.matmul %106, %107, %cst_45 {dimension_numbers = #tpu.dot_dimension_numbers<[1], [0], [0], [1], [0, 0, 1, 1], [], []>} : vector<18x32xbf16>, vector<32x128xbf16>, vector<18x128xf32> -> vector<18x128xf32>
      %109 = vector.extract_strided_slice %72 {offsets = [0, 32], sizes = [9, 32], strides = [1, 1]} : vector<18x384xf32> to vector<9x32xf32>
      %110 = vector.extract_strided_slice %72 {offsets = [0, 160], sizes = [9, 32], strides = [1, 1]} : vector<18x384xf32> to vector<9x32xf32>
      %111 = vector.extract_strided_slice %72 {offsets = [0, 288], sizes = [9, 32], strides = [1, 1]} : vector<18x384xf32> to vector<9x32xf32>
      %112 = tpu.transpose %110, [1, 0] : vector<9x32xf32> -> vector<32x9xf32>
      %cst_46 = arith.constant dense<0.000000e+00> : vector<9x9xf32>
      %113 = tpu.matmul %109, %112, %cst_46 {dimension_numbers = #tpu.dot_dimension_numbers<[1], [0], [0], [1], [0, 0, 1, 1], [], []>} : vector<9x32xf32>, vector<32x9xf32>, vector<9x9xf32> -> vector<9x9xf32>
      %cst_47 = arith.constant dense<0xFF800000> : vector<9xf32>
      %114 = vector.multi_reduction <maximumf>, %113, %cst_47 [1] : vector<9x9xf32> to vector<9xf32>
      %115 = vector.shape_cast %114 : vector<9xf32> to vector<9x1xf32>
      %116 = vector.broadcast %115 : vector<9x1xf32> to vector<9x9xf32>
      %117 = arith.subf %113, %116 : vector<9x9xf32>
      %118 = math.exp %117 : vector<9x9xf32>
      %cst_48 = arith.constant dense<0.000000e+00> : vector<9xf32>
      %119 = vector.multi_reduction <add>, %118, %cst_48 [1] : vector<9x9xf32> to vector<9xf32>
      %120 = vector.shape_cast %119 : vector<9xf32> to vector<9x1xf32>
      %121 = tpu.reciprocal %120 {approx = true} : vector<9x1xf32> -> vector<9x1xf32>
      %122 = vector.broadcast %121 : vector<9x1xf32> to vector<9x9xf32>
      %123 = arith.mulf %118, %122 : vector<9x9xf32>
      %cst_49 = arith.constant dense<0.000000e+00> : vector<9x32xf32>
      %124 = tpu.matmul %123, %111, %cst_49 {dimension_numbers = #tpu.dot_dimension_numbers<[1], [0], [0], [1], [0, 0, 1, 1], [], []>} : vector<9x9xf32>, vector<9x32xf32>, vector<9x32xf32> -> vector<9x32xf32>
      %125 = vector.extract_strided_slice %72 {offsets = [9, 32], sizes = [9, 32], strides = [1, 1]} : vector<18x384xf32> to vector<9x32xf32>
      %126 = vector.extract_strided_slice %72 {offsets = [9, 160], sizes = [9, 32], strides = [1, 1]} : vector<18x384xf32> to vector<9x32xf32>
      %127 = vector.extract_strided_slice %72 {offsets = [9, 288], sizes = [9, 32], strides = [1, 1]} : vector<18x384xf32> to vector<9x32xf32>
      %128 = tpu.transpose %126, [1, 0] : vector<9x32xf32> -> vector<32x9xf32>
      %cst_50 = arith.constant dense<0.000000e+00> : vector<9x9xf32>
      %129 = tpu.matmul %125, %128, %cst_50 {dimension_numbers = #tpu.dot_dimension_numbers<[1], [0], [0], [1], [0, 0, 1, 1], [], []>} : vector<9x32xf32>, vector<32x9xf32>, vector<9x9xf32> -> vector<9x9xf32>
      %cst_51 = arith.constant dense<0xFF800000> : vector<9xf32>
      %130 = vector.multi_reduction <maximumf>, %129, %cst_51 [1] : vector<9x9xf32> to vector<9xf32>
      %131 = vector.shape_cast %130 : vector<9xf32> to vector<9x1xf32>
      %132 = vector.broadcast %131 : vector<9x1xf32> to vector<9x9xf32>
      %133 = arith.subf %129, %132 : vector<9x9xf32>
      %134 = math.exp %133 : vector<9x9xf32>
      %cst_52 = arith.constant dense<0.000000e+00> : vector<9xf32>
      %135 = vector.multi_reduction <add>, %134, %cst_52 [1] : vector<9x9xf32> to vector<9xf32>
      %136 = vector.shape_cast %135 : vector<9xf32> to vector<9x1xf32>
      %137 = tpu.reciprocal %136 {approx = true} : vector<9x1xf32> -> vector<9x1xf32>
      %138 = vector.broadcast %137 : vector<9x1xf32> to vector<9x9xf32>
      %139 = arith.mulf %134, %138 : vector<9x9xf32>
      %cst_53 = arith.constant dense<0.000000e+00> : vector<9x32xf32>
      %140 = tpu.matmul %139, %127, %cst_53 {dimension_numbers = #tpu.dot_dimension_numbers<[1], [0], [0], [1], [0, 0, 1, 1], [], []>} : vector<9x9xf32>, vector<9x32xf32>, vector<9x32xf32> -> vector<9x32xf32>
      %141 = tpu.concatenate %124, %140 in 0 : vector<9x32xf32>, vector<9x32xf32> -> vector<18x32xf32>
      %142 = arith.truncf %141 : vector<18x32xf32> to vector<18x32xbf16>
      %c32 = arith.constant 32 : index
      %c0_54 = arith.constant 0 : index
      %143 = vector.load %arg4[%c32, %c0_54] : memref<128x128xbf16, #tpu.memory_space<vmem>>, vector<32x128xbf16>
      %cst_55 = arith.constant dense<0.000000e+00> : vector<18x128xf32>
      %144 = tpu.matmul %142, %143, %cst_55 {dimension_numbers = #tpu.dot_dimension_numbers<[1], [0], [0], [1], [0, 0, 1, 1], [], []>} : vector<18x32xbf16>, vector<32x128xbf16>, vector<18x128xf32> -> vector<18x128xf32>
      %145 = arith.addf %108, %144 : vector<18x128xf32>
      %146 = vector.extract_strided_slice %72 {offsets = [0, 64], sizes = [9, 32], strides = [1, 1]} : vector<18x384xf32> to vector<9x32xf32>
      %147 = vector.extract_strided_slice %72 {offsets = [0, 192], sizes = [9, 32], strides = [1, 1]} : vector<18x384xf32> to vector<9x32xf32>
      %148 = vector.extract_strided_slice %72 {offsets = [0, 320], sizes = [9, 32], strides = [1, 1]} : vector<18x384xf32> to vector<9x32xf32>
      %149 = tpu.transpose %147, [1, 0] : vector<9x32xf32> -> vector<32x9xf32>
      %cst_56 = arith.constant dense<0.000000e+00> : vector<9x9xf32>
      %150 = tpu.matmul %146, %149, %cst_56 {dimension_numbers = #tpu.dot_dimension_numbers<[1], [0], [0], [1], [0, 0, 1, 1], [], []>} : vector<9x32xf32>, vector<32x9xf32>, vector<9x9xf32> -> vector<9x9xf32>
      %cst_57 = arith.constant dense<0xFF800000> : vector<9xf32>
      %151 = vector.multi_reduction <maximumf>, %150, %cst_57 [1] : vector<9x9xf32> to vector<9xf32>
      %152 = vector.shape_cast %151 : vector<9xf32> to vector<9x1xf32>
      %153 = vector.broadcast %152 : vector<9x1xf32> to vector<9x9xf32>
      %154 = arith.subf %150, %153 : vector<9x9xf32>
      %155 = math.exp %154 : vector<9x9xf32>
      %cst_58 = arith.constant dense<0.000000e+00> : vector<9xf32>
      %156 = vector.multi_reduction <add>, %155, %cst_58 [1] : vector<9x9xf32> to vector<9xf32>
      %157 = vector.shape_cast %156 : vector<9xf32> to vector<9x1xf32>
      %158 = tpu.reciprocal %157 {approx = true} : vector<9x1xf32> -> vector<9x1xf32>
      %159 = vector.broadcast %158 : vector<9x1xf32> to vector<9x9xf32>
      %160 = arith.mulf %155, %159 : vector<9x9xf32>
      %cst_59 = arith.constant dense<0.000000e+00> : vector<9x32xf32>
      %161 = tpu.matmul %160, %148, %cst_59 {dimension_numbers = #tpu.dot_dimension_numbers<[1], [0], [0], [1], [0, 0, 1, 1], [], []>} : vector<9x9xf32>, vector<9x32xf32>, vector<9x32xf32> -> vector<9x32xf32>
      %162 = vector.extract_strided_slice %72 {offsets = [9, 64], sizes = [9, 32], strides = [1, 1]} : vector<18x384xf32> to vector<9x32xf32>
      %163 = vector.extract_strided_slice %72 {offsets = [9, 192], sizes = [9, 32], strides = [1, 1]} : vector<18x384xf32> to vector<9x32xf32>
      %164 = vector.extract_strided_slice %72 {offsets = [9, 320], sizes = [9, 32], strides = [1, 1]} : vector<18x384xf32> to vector<9x32xf32>
      %165 = tpu.transpose %163, [1, 0] : vector<9x32xf32> -> vector<32x9xf32>
      %cst_60 = arith.constant dense<0.000000e+00> : vector<9x9xf32>
      %166 = tpu.matmul %162, %165, %cst_60 {dimension_numbers = #tpu.dot_dimension_numbers<[1], [0], [0], [1], [0, 0, 1, 1], [], []>} : vector<9x32xf32>, vector<32x9xf32>, vector<9x9xf32> -> vector<9x9xf32>
      %cst_61 = arith.constant dense<0xFF800000> : vector<9xf32>
      %167 = vector.multi_reduction <maximumf>, %166, %cst_61 [1] : vector<9x9xf32> to vector<9xf32>
      %168 = vector.shape_cast %167 : vector<9xf32> to vector<9x1xf32>
      %169 = vector.broadcast %168 : vector<9x1xf32> to vector<9x9xf32>
      %170 = arith.subf %166, %169 : vector<9x9xf32>
      %171 = math.exp %170 : vector<9x9xf32>
      %cst_62 = arith.constant dense<0.000000e+00> : vector<9xf32>
      %172 = vector.multi_reduction <add>, %171, %cst_62 [1] : vector<9x9xf32> to vector<9xf32>
      %173 = vector.shape_cast %172 : vector<9xf32> to vector<9x1xf32>
      %174 = tpu.reciprocal %173 {approx = true} : vector<9x1xf32> -> vector<9x1xf32>
      %175 = vector.broadcast %174 : vector<9x1xf32> to vector<9x9xf32>
      %176 = arith.mulf %171, %175 : vector<9x9xf32>
      %cst_63 = arith.constant dense<0.000000e+00> : vector<9x32xf32>
      %177 = tpu.matmul %176, %164, %cst_63 {dimension_numbers = #tpu.dot_dimension_numbers<[1], [0], [0], [1], [0, 0, 1, 1], [], []>} : vector<9x9xf32>, vector<9x32xf32>, vector<9x32xf32> -> vector<9x32xf32>
      %178 = tpu.concatenate %161, %177 in 0 : vector<9x32xf32>, vector<9x32xf32> -> vector<18x32xf32>
      %179 = arith.truncf %178 : vector<18x32xf32> to vector<18x32xbf16>
      %c64 = arith.constant 64 : index
      %c0_64 = arith.constant 0 : index
      %180 = vector.load %arg4[%c64, %c0_64] : memref<128x128xbf16, #tpu.memory_space<vmem>>, vector<32x128xbf16>
      %cst_65 = arith.constant dense<0.000000e+00> : vector<18x128xf32>
      %181 = tpu.matmul %179, %180, %cst_65 {dimension_numbers = #tpu.dot_dimension_numbers<[1], [0], [0], [1], [0, 0, 1, 1], [], []>} : vector<18x32xbf16>, vector<32x128xbf16>, vector<18x128xf32> -> vector<18x128xf32>
      %182 = arith.addf %145, %181 : vector<18x128xf32>
      %183 = vector.extract_strided_slice %72 {offsets = [0, 96], sizes = [9, 32], strides = [1, 1]} : vector<18x384xf32> to vector<9x32xf32>
      %184 = vector.extract_strided_slice %72 {offsets = [0, 224], sizes = [9, 32], strides = [1, 1]} : vector<18x384xf32> to vector<9x32xf32>
      %185 = vector.extract_strided_slice %72 {offsets = [0, 352], sizes = [9, 32], strides = [1, 1]} : vector<18x384xf32> to vector<9x32xf32>
      %186 = tpu.transpose %184, [1, 0] : vector<9x32xf32> -> vector<32x9xf32>
      %cst_66 = arith.constant dense<0.000000e+00> : vector<9x9xf32>
      %187 = tpu.matmul %183, %186, %cst_66 {dimension_numbers = #tpu.dot_dimension_numbers<[1], [0], [0], [1], [0, 0, 1, 1], [], []>} : vector<9x32xf32>, vector<32x9xf32>, vector<9x9xf32> -> vector<9x9xf32>
      %cst_67 = arith.constant dense<0xFF800000> : vector<9xf32>
      %188 = vector.multi_reduction <maximumf>, %187, %cst_67 [1] : vector<9x9xf32> to vector<9xf32>
      %189 = vector.shape_cast %188 : vector<9xf32> to vector<9x1xf32>
      %190 = vector.broadcast %189 : vector<9x1xf32> to vector<9x9xf32>
      %191 = arith.subf %187, %190 : vector<9x9xf32>
      %192 = math.exp %191 : vector<9x9xf32>
      %cst_68 = arith.constant dense<0.000000e+00> : vector<9xf32>
      %193 = vector.multi_reduction <add>, %192, %cst_68 [1] : vector<9x9xf32> to vector<9xf32>
      %194 = vector.shape_cast %193 : vector<9xf32> to vector<9x1xf32>
      %195 = tpu.reciprocal %194 {approx = true} : vector<9x1xf32> -> vector<9x1xf32>
      %196 = vector.broadcast %195 : vector<9x1xf32> to vector<9x9xf32>
      %197 = arith.mulf %192, %196 : vector<9x9xf32>
      %cst_69 = arith.constant dense<0.000000e+00> : vector<9x32xf32>
      %198 = tpu.matmul %197, %185, %cst_69 {dimension_numbers = #tpu.dot_dimension_numbers<[1], [0], [0], [1], [0, 0, 1, 1], [], []>} : vector<9x9xf32>, vector<9x32xf32>, vector<9x32xf32> -> vector<9x32xf32>
      %199 = vector.extract_strided_slice %72 {offsets = [9, 96], sizes = [9, 32], strides = [1, 1]} : vector<18x384xf32> to vector<9x32xf32>
      %200 = vector.extract_strided_slice %72 {offsets = [9, 224], sizes = [9, 32], strides = [1, 1]} : vector<18x384xf32> to vector<9x32xf32>
      %201 = vector.extract_strided_slice %72 {offsets = [9, 352], sizes = [9, 32], strides = [1, 1]} : vector<18x384xf32> to vector<9x32xf32>
      %202 = tpu.transpose %200, [1, 0] : vector<9x32xf32> -> vector<32x9xf32>
      %cst_70 = arith.constant dense<0.000000e+00> : vector<9x9xf32>
      %203 = tpu.matmul %199, %202, %cst_70 {dimension_numbers = #tpu.dot_dimension_numbers<[1], [0], [0], [1], [0, 0, 1, 1], [], []>} : vector<9x32xf32>, vector<32x9xf32>, vector<9x9xf32> -> vector<9x9xf32>
      %cst_71 = arith.constant dense<0xFF800000> : vector<9xf32>
      %204 = vector.multi_reduction <maximumf>, %203, %cst_71 [1] : vector<9x9xf32> to vector<9xf32>
      %205 = vector.shape_cast %204 : vector<9xf32> to vector<9x1xf32>
      %206 = vector.broadcast %205 : vector<9x1xf32> to vector<9x9xf32>
      %207 = arith.subf %203, %206 : vector<9x9xf32>
      %208 = math.exp %207 : vector<9x9xf32>
      %cst_72 = arith.constant dense<0.000000e+00> : vector<9xf32>
      %209 = vector.multi_reduction <add>, %208, %cst_72 [1] : vector<9x9xf32> to vector<9xf32>
      %210 = vector.shape_cast %209 : vector<9xf32> to vector<9x1xf32>
      %211 = tpu.reciprocal %210 {approx = true} : vector<9x1xf32> -> vector<9x1xf32>
      %212 = vector.broadcast %211 : vector<9x1xf32> to vector<9x9xf32>
      %213 = arith.mulf %208, %212 : vector<9x9xf32>
      %cst_73 = arith.constant dense<0.000000e+00> : vector<9x32xf32>
      %214 = tpu.matmul %213, %201, %cst_73 {dimension_numbers = #tpu.dot_dimension_numbers<[1], [0], [0], [1], [0, 0, 1, 1], [], []>} : vector<9x9xf32>, vector<9x32xf32>, vector<9x32xf32> -> vector<9x32xf32>
      %215 = tpu.concatenate %198, %214 in 0 : vector<9x32xf32>, vector<9x32xf32> -> vector<18x32xf32>
      %216 = arith.truncf %215 : vector<18x32xf32> to vector<18x32xbf16>
      %c96 = arith.constant 96 : index
      %c0_74 = arith.constant 0 : index
      %217 = vector.load %arg4[%c96, %c0_74] : memref<128x128xbf16, #tpu.memory_space<vmem>>, vector<32x128xbf16>
      %cst_75 = arith.constant dense<0.000000e+00> : vector<18x128xf32>
      %218 = tpu.matmul %216, %217, %cst_75 {dimension_numbers = #tpu.dot_dimension_numbers<[1], [0], [0], [1], [0, 0, 1, 1], [], []>} : vector<18x32xbf16>, vector<32x128xbf16>, vector<18x128xf32> -> vector<18x128xf32>
      %219 = arith.addf %182, %218 : vector<18x128xf32>
      %220 = arith.addf %40, %219 : vector<18x128xf32>
      %c0_76 = arith.constant 0 : index
      %c0_77 = arith.constant 0 : index
      %221 = vector.load %arg5[%c0_76, %c0_77] : memref<1x128xf32, #tpu.memory_space<vmem>>, vector<1x128xf32>
      %222 = vector.broadcast %221 : vector<1x128xf32> to vector<18x128xf32>
      %223 = arith.addf %220, %222 : vector<18x128xf32>
      %cst_78 = arith.constant dense<0.000000e+00> : vector<18xf32>
      %224 = vector.multi_reduction <add>, %223, %cst_78 [1] : vector<18x128xf32> to vector<18xf32>
      %225 = vector.shape_cast %224 : vector<18xf32> to vector<18x1xf32>
      %cst_79 = arith.constant 1.280000e+02 : f32
      %226 = vector.broadcast %cst_79 : f32 to vector<18x1xf32>
      %227 = arith.divf %225, %226 : vector<18x1xf32>
      %228 = vector.broadcast %227 : vector<18x1xf32> to vector<18x128xf32>
      %229 = arith.subf %223, %228 : vector<18x128xf32>
      %230 = arith.mulf %229, %229 : vector<18x128xf32>
      %cst_80 = arith.constant dense<0.000000e+00> : vector<18xf32>
      %231 = vector.multi_reduction <add>, %230, %cst_80 [1] : vector<18x128xf32> to vector<18xf32>
      %232 = vector.shape_cast %231 : vector<18xf32> to vector<18x1xf32>
      %cst_81 = arith.constant 1.280000e+02 : f32
      %233 = vector.broadcast %cst_81 : f32 to vector<18x1xf32>
      %234 = arith.divf %232, %233 : vector<18x1xf32>
      %235 = vector.broadcast %227 : vector<18x1xf32> to vector<18x128xf32>
      %236 = arith.subf %223, %235 : vector<18x128xf32>
      %cst_82 = arith.constant 9.99999974E-6 : f32
      %237 = vector.broadcast %cst_82 : f32 to vector<18x1xf32>
      %238 = arith.addf %234, %237 : vector<18x1xf32>
      %239 = math.rsqrt %238 : vector<18x1xf32>
      %240 = vector.broadcast %239 : vector<18x1xf32> to vector<18x128xf32>
      %241 = arith.mulf %236, %240 : vector<18x128xf32>
      %242 = vector.broadcast %46 : vector<1x128xf32> to vector<18x128xf32>
      %243 = arith.mulf %241, %242 : vector<18x128xf32>
      %244 = vector.broadcast %47 : vector<1x128xf32> to vector<18x128xf32>
      %245 = arith.addf %243, %244 : vector<18x128xf32>
      %246 = arith.truncf %245 : vector<18x128xf32> to vector<18x128xbf16>
      %c0_83 = arith.constant 0 : index
      %c0_84 = arith.constant 0 : index
      %247 = vector.load %arg6[%c0_83, %c0_84] : memref<128x256xbf16, #tpu.memory_space<vmem>>, vector<128x256xbf16>
      %cst_85 = arith.constant dense<0.000000e+00> : vector<18x256xf32>
      %248 = tpu.matmul %246, %247, %cst_85 {dimension_numbers = #tpu.dot_dimension_numbers<[1], [0], [0], [1], [0, 0, 1, 1], [], []>} : vector<18x128xbf16>, vector<128x256xbf16>, vector<18x256xf32> -> vector<18x256xf32>
      %c0_86 = arith.constant 0 : index
      %c0_87 = arith.constant 0 : index
      %249 = vector.load %arg7[%c0_86, %c0_87] : memref<1x256xf32, #tpu.memory_space<vmem>>, vector<1x256xf32>
      %250 = vector.broadcast %249 : vector<1x256xf32> to vector<18x256xf32>
      %251 = arith.addf %248, %250 : vector<18x256xf32>
      %cst_88 = arith.constant 5.000000e-01 : f32
      %252 = vector.broadcast %cst_88 : f32 to vector<18x256xf32>
      %253 = arith.mulf %252, %251 : vector<18x256xf32>
      %cst_89 = arith.constant 0.707106769 : f32
      %254 = vector.broadcast %cst_89 : f32 to vector<18x256xf32>
      %255 = arith.mulf %251, %254 : vector<18x256xf32>
      %256 = math.erf %255 : vector<18x256xf32>
      %cst_90 = arith.constant 1.000000e+00 : f32
      %257 = vector.broadcast %cst_90 : f32 to vector<18x256xf32>
      %258 = arith.addf %257, %256 : vector<18x256xf32>
      %259 = arith.mulf %253, %258 : vector<18x256xf32>
      %260 = arith.truncf %259 : vector<18x256xf32> to vector<18x256xbf16>
      %c0_91 = arith.constant 0 : index
      %c0_92 = arith.constant 0 : index
      %261 = vector.load %arg8[%c0_91, %c0_92] : memref<256x128xbf16, #tpu.memory_space<vmem>>, vector<256x128xbf16>
      %cst_93 = arith.constant dense<0.000000e+00> : vector<18x128xf32>
      %262 = tpu.matmul %260, %261, %cst_93 {dimension_numbers = #tpu.dot_dimension_numbers<[1], [0], [0], [1], [0, 0, 1, 1], [], []>} : vector<18x256xbf16>, vector<256x128xbf16>, vector<18x128xf32> -> vector<18x128xf32>
      %c0_94 = arith.constant 0 : index
      %c0_95 = arith.constant 0 : index
      %263 = vector.load %arg9[%c0_94, %c0_95] : memref<1x128xf32, #tpu.memory_space<vmem>>, vector<1x128xf32>
      %264 = vector.broadcast %263 : vector<1x128xf32> to vector<18x128xf32>
      %265 = arith.addf %262, %264 : vector<18x128xf32>
      %266 = arith.addf %223, %265 : vector<18x128xf32>
      %c0_96 = arith.constant 0 : index
      %c0_97 = arith.constant 0 : index
      %267 = vector.load %arg15[%c0_96, %c0_97] : memref<18x128xf32, #tpu.memory_space<vmem>>, vector<18x128xf32>
      tpu.vector_store %arg15[%c0_96, %c0_97], %266 {strides = array<i32>} : memref<18x128xf32, #tpu.memory_space<vmem>>, vector<18x128xf32>,
    }
    %c2_i32_3 = arith.constant 2 : i32
    %c0_4 = arith.constant 0 : index
    %c0_5 = arith.constant 0 : index
    %3 = vector.load %arg15[%c0_4, %c0_5] : memref<18x128xf32, #tpu.memory_space<vmem>>, vector<18x128xf32>
    %4 = vector.extract_strided_slice %3 {offsets = [0, 0], sizes = [1, 128], strides = [1, 1]} : vector<18x128xf32> to vector<1x128xf32>
    %5 = vector.extract_strided_slice %3 {offsets = [9, 0], sizes = [1, 128], strides = [1, 1]} : vector<18x128xf32> to vector<1x128xf32>
    %6 = tpu.concatenate %4, %5 in 0 : vector<1x128xf32>, vector<1x128xf32> -> vector<2x128xf32>
    %c0_6 = arith.constant 0 : index
    %c0_7 = arith.constant 0 : index
    %7 = vector.load %arg10[%c0_6, %c0_7] : memref<1x128xf32, #tpu.memory_space<vmem>>, vector<1x128xf32>
    %c0_8 = arith.constant 0 : index
    %c0_9 = arith.constant 0 : index
    %8 = vector.load %arg11[%c0_8, %c0_9] : memref<1x128xf32, #tpu.memory_space<vmem>>, vector<1x128xf32>
    %cst = arith.constant dense<0.000000e+00> : vector<2xf32>
    %9 = vector.multi_reduction <add>, %6, %cst [1] : vector<2x128xf32> to vector<2xf32>
    %10 = vector.shape_cast %9 : vector<2xf32> to vector<2x1xf32>
    %cst_10 = arith.constant 1.280000e+02 : f32
    %11 = vector.broadcast %cst_10 : f32 to vector<2x1xf32>
    %12 = arith.divf %10, %11 : vector<2x1xf32>
    %13 = vector.broadcast %12 : vector<2x1xf32> to vector<2x128xf32>
    %14 = arith.subf %6, %13 : vector<2x128xf32>
    %15 = arith.mulf %14, %14 : vector<2x128xf32>
    %cst_11 = arith.constant dense<0.000000e+00> : vector<2xf32>
    %16 = vector.multi_reduction <add>, %15, %cst_11 [1] : vector<2x128xf32> to vector<2xf32>
    %17 = vector.shape_cast %16 : vector<2xf32> to vector<2x1xf32>
    %cst_12 = arith.constant 1.280000e+02 : f32
    %18 = vector.broadcast %cst_12 : f32 to vector<2x1xf32>
    %19 = arith.divf %17, %18 : vector<2x1xf32>
    %20 = vector.broadcast %12 : vector<2x1xf32> to vector<2x128xf32>
    %21 = arith.subf %6, %20 : vector<2x128xf32>
    %cst_13 = arith.constant 9.99999974E-6 : f32
    %22 = vector.broadcast %cst_13 : f32 to vector<2x1xf32>
    %23 = arith.addf %19, %22 : vector<2x1xf32>
    %24 = math.rsqrt %23 : vector<2x1xf32>
    %25 = vector.broadcast %24 : vector<2x1xf32> to vector<2x128xf32>
    %26 = arith.mulf %21, %25 : vector<2x128xf32>
    %27 = vector.broadcast %7 : vector<1x128xf32> to vector<2x128xf32>
    %28 = arith.mulf %26, %27 : vector<2x128xf32>
    %29 = vector.broadcast %8 : vector<1x128xf32> to vector<2x128xf32>
    %30 = arith.addf %28, %29 : vector<2x128xf32>
    %31 = arith.truncf %30 : vector<2x128xf32> to vector<2x128xbf16>
    %c0_14 = arith.constant 0 : index
    %c0_15 = arith.constant 0 : index
    %32 = vector.load %arg12[%c0_14, %c0_15] : memref<128x16xbf16, #tpu.memory_space<vmem>>, vector<128x16xbf16>
    %cst_16 = arith.constant dense<0.000000e+00> : vector<2x16xf32>
    %33 = tpu.matmul %31, %32, %cst_16 {dimension_numbers = #tpu.dot_dimension_numbers<[1], [0], [0], [1], [0, 0, 1, 1], [], []>} : vector<2x128xbf16>, vector<128x16xbf16>, vector<2x16xf32> -> vector<2x16xf32>
    %c0_17 = arith.constant 0 : index
    %c0_18 = arith.constant 0 : index
    %34 = vector.load %arg13[%c0_17, %c0_18] : memref<1x16xf32, #tpu.memory_space<vmem>>, vector<1x16xf32>
    %35 = vector.broadcast %34 : vector<1x16xf32> to vector<2x16xf32>
    %36 = arith.addf %33, %35 : vector<2x16xf32>
    %c0_19 = arith.constant 0 : index
    %c0_20 = arith.constant 0 : index
    %37 = vector.load %arg14[%c0_19, %c0_20] : memref<2x16xf32, #tpu.memory_space<vmem>>, vector<2x16xf32>
    tpu.vector_store %arg14[%c0_19, %c0_20], %36 {strides = array<i32>} : memref<2x16xf32, #tpu.memory_space<vmem>>, vector<2x16xf32>,
    return
  }
  func.func @transform_0(%arg0: i32) -> (i32, i32) {
    %c0_i32 = arith.constant 0 : i32
    %c0_i32_0 = arith.constant 0 : i32
    return %arg0, %c0_i32 : i32, i32
  }
  func.func @transform_1(%arg0: i32) -> (i32, i32, i32) {
    %c0_i32 = arith.constant 0 : i32
    %c0_i32_0 = arith.constant 0 : i32
    %c0_i32_1 = arith.constant 0 : i32
    %c0_i32_2 = arith.constant 0 : i32
    return %c0_i32, %c0_i32_0, %c0_i32_1 : i32, i32, i32
  }
  func.func @transform_2(%arg0: i32) -> (i32, i32) {
    %c0_i32 = arith.constant 0 : i32
    %c0_i32_0 = arith.constant 0 : i32
    %c0_i32_1 = arith.constant 0 : i32
    return %c0_i32, %c0_i32_0 : i32, i32
  }
  func.func @transform_3(%arg0: i32) -> (i32, i32) {
    %c0_i32 = arith.constant 0 : i32
    %c0_i32_0 = arith.constant 0 : i32
    %c0_i32_1 = arith.constant 0 : i32
    return %c0_i32, %c0_i32_0 : i32, i32
  }
  func.func @transform_4(%arg0: i32) -> (i32, i32) {
    %c0_i32 = arith.constant 0 : i32
    %c0_i32_0 = arith.constant 0 : i32
    %c0_i32_1 = arith.constant 0 : i32
    return %c0_i32, %c0_i32_0 : i32, i32
  }
  func.func @transform_5(%arg0: i32) -> (i32, i32) {
    %c0_i32 = arith.constant 0 : i32
    %c0_i32_0 = arith.constant 0 : i32
    %c0_i32_1 = arith.constant 0 : i32
    return %c0_i32, %c0_i32_0 : i32, i32
  }
  func.func @transform_6(%arg0: i32) -> (i32, i32) {
    %c0_i32 = arith.constant 0 : i32
    %c0_i32_0 = arith.constant 0 : i32
    %c0_i32_1 = arith.constant 0 : i32
    return %c0_i32, %c0_i32_0 : i32, i32
  }
  func.func @transform_7(%arg0: i32) -> (i32, i32) {
    %c0_i32 = arith.constant 0 : i32
    %c0_i32_0 = arith.constant 0 : i32
    %c0_i32_1 = arith.constant 0 : i32
    return %c0_i32, %c0_i32_0 : i32, i32
  }
  func.func @transform_8(%arg0: i32) -> (i32, i32) {
    %c0_i32 = arith.constant 0 : i32
    %c0_i32_0 = arith.constant 0 : i32
    %c0_i32_1 = arith.constant 0 : i32
    return %c0_i32, %c0_i32_0 : i32, i32
  }
  func.func @transform_9(%arg0: i32) -> (i32, i32) {
    %c0_i32 = arith.constant 0 : i32
    %c0_i32_0 = arith.constant 0 : i32
    %c0_i32_1 = arith.constant 0 : i32
    return %c0_i32, %c0_i32_0 : i32, i32
  }
  func.func @transform_10(%arg0: i32) -> (i32, i32) {
    %c0_i32 = arith.constant 0 : i32
    %c0_i32_0 = arith.constant 0 : i32
    %c0_i32_1 = arith.constant 0 : i32
    return %c0_i32, %c0_i32_0 : i32, i32
  }
  func.func @transform_11(%arg0: i32) -> (i32, i32) {
    %c0_i32 = arith.constant 0 : i32
    %c0_i32_0 = arith.constant 0 : i32
    %c0_i32_1 = arith.constant 0 : i32
    return %c0_i32, %c0_i32_0 : i32, i32
  }
  func.func @transform_12(%arg0: i32) -> (i32, i32) {
    %c0_i32 = arith.constant 0 : i32
    %c0_i32_0 = arith.constant 0 : i32
    %c0_i32_1 = arith.constant 0 : i32
    return %c0_i32, %c0_i32_0 : i32, i32
  }
  func.func @transform_13(%arg0: i32) -> (i32, i32) {
    %c0_i32 = arith.constant 0 : i32
    %c0_i32_0 = arith.constant 0 : i32
    return %arg0, %c0_i32 : i32, i32
  }
}

</mosaic_0001>

<bundles_post_ra>
// kernel: cot_forward.1
= control target key start
LH: loop header
LB: loop body
LE: loop exit
PB: predicated region body
PF: predicated region fallthrough
CT: control target
= control target key end

     0   :  { %18 = vsyncpa [#allocation4], 0  ;;  %s2821_s14 = smov 0   ;;  %s3750_s0 = inlined_call_operand.vmem [shape: f32[18,128], index: 0, kind: input, shape index: {}]   ;;  %s3751_s1 = inlined_call_operand.vmem [shape: f32[2,4,128], index: 1, kind: input, shape index: {}]   ;;  %s3752_s2 = inlined_call_operand.vmem [shape: bf16[128,384], index: 2, kind: input, shape index: {}]   ;;  %s3753_s3 = inlined_call_operand.vmem [shape: bf16[128,128], index: 3, kind: input, shape index: {}]   ;;  %s3754_s4 = inlined_call_operand.vmem [shape: f32[1,128], index: 4, kind: input, shape index: {}]   ;;  %s3755_s5 = inlined_call_operand.vmem [shape: bf16[128,256], index: 5, kind: input, shape index: {}]   ;;  %s3756_s6 = inlined_call_operand.vmem [shape: f32[1,256], index: 6, kind: input, shape index: {}]   ;;  %s3757_s7 = inlined_call_operand.vmem [shape: bf16[256,128], index: 7, kind: input, shape index: {}]   ;;  %s3758_s8 = inlined_call_operand.vmem [shape: f32[1,128], index: 8, kind: input, shape index: {}]   ;;  %s3759_s9 = inlined_call_operand.vmem [shape: f32[1,128], index: 9, kind: input, shape index: {}]   ;;  %s3760_s10 = inlined_call_operand.vmem [shape: f32[1,128], index: 10, kind: input, shape index: {}]   ;;  %s3761_s11 = inlined_call_operand.vmem [shape: bf16[128,16], index: 11, kind: input, shape index: {}]   ;;  %s3762_s12 = inlined_call_operand.vmem [shape: f32[1,16], index: 12, kind: input, shape index: {}]   ;;  %s3763_s13 = inlined_call_operand.hbm [shape: f32[2,16], index: 13, kind: output, shape index: {}]  }
   0x1   :  { %v46_v0 = vld [vmem:[%s3750_s0] sm:$0xff]  ;;  %v47_v1 = vld [vmem:[%s3750_s0 + $0x8] sm:$0xff]  ;;  %v48_v2 = vld [vmem:[%s3750_s0 + $0x10] sm:$0x3] }
   0x2   :  { %49 = vst [vmem:[#allocation2 + $0x10] sm:$0xff] %v46_v0 }
   0x3   :  { %50 = vst [vmem:[#allocation2] sm:$0xff] %v47_v1 }
   0x4   :  { %51 = vst [vmem:[#allocation2 + $0x8] sm:$0x3] %v48_v2 }
   0x5 LB: > { %vm68_vm0 = vcmask 1041408   ;;  %v2737_v7 = vmov 128.0   ;;  %v2238_v27 = vld [vmem:[%s3752_s2 + $0xa8] sm:$0xf]  ;;  %v2532_v28 = vld [vmem:[%s3752_s2 + $0xb0] sm:$0xf0]  ;;  %s2735_s14 = sphi %s2821_s14, %s57_s14  }
   0x6   : > { %2604 = vrcp.f32 %v2737_v7  ;;  %v2531_v29 = vld [vmem:[%s3752_s2 + $0xac] sm:$0xf]  ;;  %v2239_v30 = vor.u32 %v2532_v28, %v2238_v27  ;;  %v2240_v31 = vld [vmem:[%s3752_s2 + $0xb4] sm:$0xf0]  ;;  %v2246_v32 = vld [vmem:[%s3752_s2 + $0xb0] sm:$0xf] }
   0x7   : > { %v2533_v33 = vld [vmem:[%s3752_s2 + $0xb8] sm:$0xf0]  ;;  %v2243_v34 = vor.u32 %v2531_v29, %v2240_v31  ;;  %v2226_v36 = vld [vmem:[%s3752_s2 + $0x90] sm:$0xf]  ;;  %v2528_v38 = vld [vmem:[%s3752_s2 + $0x94] sm:$0xf] }
   0x8   : > { %v2247_v35 = vor.u32 %v2533_v33, %v2246_v32  ;;  %304 = vmatpush.bf16.msra.mxu0 %v2239_v30  ;;  %v2529_v37 = vld [vmem:[%s3752_s2 + $0x98] sm:$0xf0]  ;;  %v2228_v40 = vld [vmem:[%s3752_s2 + $0x9c] sm:$0xf0]  ;;  %v2234_v41 = vld [vmem:[%s3752_s2 + $0x98] sm:$0xf] }
   0x9   : > { %v58_v3 = vld [vmem:[#allocation2 + $0x10] sm:$0xff]  ;;  %322 = vmatpush.bf16.msra.mxu1 %v2243_v34  ;;  %v2227_v39 = vor.u32 %v2529_v37, %v2226_v36  ;;  %v2530_v42 = vld [vmem:[%s3752_s2 + $0xa0] sm:$0xf0]  ;;  %v2231_v43 = vor.u32 %v2528_v38, %v2228_v40  ;;  %v2214_v45 = vld [vmem:[%s3752_s2 + $0x78] sm:$0xf]  ;;  %s2151_s25 = sshll.u32 %s2735_s14, 2 }
   0xa   : > { %64 = vadd.xlane.f32.xlu0 %v58_v3  ;;  %v59_v6 = vld [vmem:[#allocation2] sm:$0xff]  ;;  %340 = vmatpush.bf16.msra.mxu2 %v2247_v35  ;;  %v2235_v44 = vor.u32 %v2530_v42, %v2234_v41  ;;  %v2525_v47 = vld [vmem:[%s3752_s2 + $0x7c] sm:$0xf]  ;;  %v2216_v49 = vld [vmem:[%s3752_s2 + $0x84] sm:$0xf0]  ;;  %s2996_s28 = scalar_lea.vmem %s3751_s1, %s2151_s25  ;;  %vm358_vm11 = vcmask 261120  }
   0xb   : > { %v60_v4 = vld [vmem:[#allocation2 + $0x8] sm:$0x3]  ;;  %v2526_v46 = vld [vmem:[%s3752_s2 + $0x80] sm:$0xf0]  ;;  %v2222_v50 = vld [vmem:[%s3752_s2 + $0x80] sm:$0xf]  ;;  %v2219_v52 = vor.u32 %v2525_v47, %v2216_v49 }
   0xc   : > { %v69_v5 = vsel %vm68_vm0, %v60_v4, 0.0  ;;  %v2605_v8 = vpop.eup %2604  ;;  %305 = vmatpush.bf16.msra.mxu0 %v2227_v39  ;;  %v2215_v48 = vor.u32 %v2526_v46, %v2214_v45  ;;  %v2527_v51 = vld [vmem:[%s3752_s2 + $0x88] sm:$0xf0]  ;;  %v2202_v54 = vld [vmem:[%s3752_s2 + $0x60] sm:$0xf]  ;;  %vm424_vm12 = vcmask 1040384  }
   0xd   : > { %70 = vadd.xlane.f32.xlu2 %v69_v5  ;;  %v73_v9 = vmul.f32 128.0, %v2605_v8  ;;  %vm77_vm1 = vweird.f32 %v2605_v8  ;;  %323 = vmatpush.bf16.msra.mxu1 %v2231_v43  ;;  %v2223_v53 = vor.u32 %v2527_v51, %v2222_v50  ;;  %v2523_v55 = vld [vmem:[%s3752_s2 + $0x68] sm:$0xf0]  ;;  %v2522_v56 = vld [vmem:[%s3752_s2 + $0x64] sm:$0xf]  ;;  %vm452_vm13 = vcmask 1046528  }
   0xe   : > { %341 = vmatpush.bf16.msra.mxu2 %v2235_v44  ;;  %v2203_v57 = vor.u32 %v2523_v55, %v2202_v54  ;;  %v2204_v58 = vld [vmem:[%s3752_s2 + $0x6c] sm:$0xf0]  ;;  %v2210_v59 = vld [vmem:[%s3752_s2 + $0x68] sm:$0xf]  ;;  %v2524_v60 = vld [vmem:[%s3752_s2 + $0x70] sm:$0xf0] }
   0xf   : > { %v74_v10 = vsub.f32 1.0, %v73_v9  ;;  %v2207_v61 = vor.u32 %v2522_v56, %v2204_v58  ;;  %v2211_v62 = vor.u32 %v2524_v60, %v2210_v59  ;;  %v2190_v63 = vld [vmem:[%s3752_s2 + $0x48] sm:$0xf]  ;;  %v2520_v0 = vld [vmem:[%s3752_s2 + $0x50] sm:$0xf0]  ;;  %vm394_vm14 = vcmask 72704  }
  0x10   : > { %306 = vmatpush.bf16.msra.mxu0 %v2215_v48  ;;  %v2519_v1 = vld [vmem:[%s3752_s2 + $0x4c] sm:$0xf]  ;;  %v2191_v2 = vor.u32 %v2520_v0, %v2190_v63  ;;  %v2521_v5 = vld [vmem:[%s3752_s2 + $0x58] sm:$0xf0]  ;;  %v2154_v30 = vld [vmem:[%s3752_s2] sm:$0xf] }
  0x11   : > { %v75_v11 = vmul.f32 %v2605_v8, %v74_v10  ;;  %324 = vmatpush.bf16.msra.mxu1 %v2219_v52  ;;  %v2517_v9 = vld [vmem:[%s3752_s2 + $0x38] sm:$0xf0]  ;;  %v2516_v10 = vld [vmem:[%s3752_s2 + $0x34] sm:$0xf]  ;;  %v2515_v27 = vld [vmem:[%s3752_s2 + $0x28] sm:$0xf0] }
  0x12   : > { %66 = vadd.xlane.f32.xlu0 %v59_v6  ;;  %342 = vmatpush.bf16.msra.mxu2 %v2223_v53  ;;  %v2511_v31 = vld [vmem:[%s3752_s2 + $0x8] sm:$0xf0]  ;;  %v2510_v32 = vld [vmem:[%s3752_s2 + $0x4] sm:$0xf]  ;;  %v2156_v35 = vld [vmem:[%s3752_s2 + $0xc] sm:$0xf0] }
  0x13   : > { %v76_v12 = vadd.f32 %v2605_v8, %v75_v11  ;;  %v2155_v34 = vor.u32 %v2511_v31, %v2154_v30  ;;  %v2162_v36 = vld [vmem:[%s3752_s2 + $0x8] sm:$0xf]  ;;  %v2512_v37 = vld [vmem:[%s3752_s2 + $0x10] sm:$0xf0]  ;;  %v2159_v39 = vor.u32 %v2510_v32, %v2156_v35  ;;  %v63_v63 = vld [vmem:[%s2996_s28] sm:$0xf] }
  0x14   : > { %307 = vmatpush.bf16.msra.mxu0 %v2203_v57  ;;  %v2163_v40 = vor.u32 %v2512_v37, %v2162_v36  ;;  %vm398_vm15 = vcmask 65536   ;;  %s2738_s29 = smov 96   ;;  %s2739_s30 = smov 64  }
  0x15   : > { %v2827_v13 = vsel %vm77_vm1, %v2605_v8, %v76_v12  ;;  %325 = vmatpush.bf16.msra.mxu1 %v2207_v61  ;;  %v2178_v8 = vld [vmem:[%s3752_s2 + $0x30] sm:$0xf]  ;;  %v2180_v12 = vld [vmem:[%s3752_s2 + $0x3c] sm:$0xf0]  ;;  %s2740_s0 = smov 32   ;;  %s57_s14 = sadd.s32 1, %s2735_s14  }
  0x16   : > { %343 = vmatpush.bf16.msra.mxu2 %v2211_v62  ;;  %v2179_v11 = vor.u32 %v2517_v9, %v2178_v8  ;;  %v138_v8 = vperm.slane %v63_v63, 1  ;;  %p54_p0 = scmp.ge.s32.totalorder %s57_s14, 2  }
  0x18   : > { %308 = vmatpush.bf16.msra.mxu0 %v2191_v2  ;;  %v134_v2 = vperm.slane %v63_v63, 0 }
  0x1c   : > { %309 = vmatpush.bf16.msra.mxu0 %v2179_v11 }
  0x7d   : > { %v65_v14 = vpop.xlane.xlu0 %64 }
  0x7e   : > { %v79_v15 = vmul.f32 %v2827_v13, %v65_v14  ;;  %v2186_v14 = vld [vmem:[%s3752_s2 + $0x38] sm:$0xf] }
  0x80   : > { %v71_v16 = vpop.xlane.xlu2 %70  ;;  %v2831_v18 = vsub.f32 %v58_v3, %v79_v15  ;;  %v2192_v3 = vld [vmem:[%s3752_s2 + $0x54] sm:$0xf0]  ;;  %v2518_v15 = vld [vmem:[%s3752_s2 + $0x40] sm:$0xf0] }
  0x81   : > { %v81_v17 = vmul.f32 %v2827_v13, %v71_v16  ;;  %v2183_v16 = vor.u32 %v2516_v10, %v2180_v12 }
  0x82   : > { %v85_v20 = vmul.f32 %v2831_v18, %v2831_v18 }
  0x83   : > { %v2833_v19 = vsub.f32 %v60_v4, %v81_v17  ;;  %v2198_v4 = vld [vmem:[%s3752_s2 + $0x50] sm:$0xf]  ;;  %v2187_v17 = vor.u32 %v2518_v15, %v2186_v14 }
  0x84   : > { %88 = vadd.xlane.f32.xlu1 %v85_v20  ;;  %v2199_v7 = vor.u32 %v2521_v5, %v2198_v4  ;;  %v2166_v20 = vld [vmem:[%s3752_s2 + $0x18] sm:$0xf] }
  0x85   : > { %v87_v21 = vmul.f32 %v2833_v19, %v2833_v19  ;;  %v67_v22 = vpop.xlane.xlu0 %66 }
  0x86   : > { %v80_v24 = vmul.f32 %v2827_v13, %v67_v22  ;;  %344 = vmatpush.bf16.msra.mxu2 %v2199_v7  ;;  %v2513_v22 = vld [vmem:[%s3752_s2 + $0x1c] sm:$0xf] }
  0x87   : > { %v92_v23 = vsel %vm68_vm0, %v87_v21, 0.0  ;;  %v2514_v21 = vld [vmem:[%s3752_s2 + $0x20] sm:$0xf0] }
  0x88   : > { %93 = vadd.xlane.f32.xlu2 %v92_v23  ;;  %v2841_v25 = vsub.f32 %v59_v6, %v80_v24  ;;  %v2195_v6 = vor.u32 %v2519_v1, %v2192_v3  ;;  %v2167_v23 = vor.u32 %v2514_v21, %v2166_v20  ;;  %v2168_v24 = vld [vmem:[%s3752_s2 + $0x24] sm:$0xf0] }
  0x89   : > { %v2171_v28 = vor.u32 %v2513_v22, %v2168_v24 }
  0x8a   : > { %v86_v26 = vmul.f32 %v2841_v25, %v2841_v25  ;;  %326 = vmatpush.bf16.msra.mxu1 %v2195_v6  ;;  %345 = vmatpush.bf16.msra.mxu2 %v2187_v17 }
  0x8b   : > { %310 = vmatpush.bf16.msra.mxu0 %v2167_v23 }
  0x8c   : > { %90 = vadd.xlane.f32.xlu1 %v86_v26  ;;  %v2174_v26 = vld [vmem:[%s3752_s2 + $0x20] sm:$0xf] }
  0x8d   : > { %v2175_v29 = vor.u32 %v2515_v27, %v2174_v26 }
  0x8e   : > { %327 = vmatpush.bf16.msra.mxu1 %v2183_v16 }
  0x8f   : > { %346 = vmatpush.bf16.msra.mxu2 %v2175_v29  ;;  %311 = vmatpush.bf16.msra.mxu0 %v2155_v34 }
  0x92   : > { %328 = vmatpush.bf16.msra.mxu1 %v2171_v28 }
  0x93   : > { %347 = vmatpush.bf16.msra.mxu2 %v2163_v40 }
  0x96   : > { %329 = vmatpush.bf16.msra.mxu1 %v2159_v39 }
  0xf7   : > { %v89_v33 = vpop.xlane.xlu1 %88 }
  0xf8   : > { %v95_v38 = vmul.f32 %v89_v33, %v2827_v13 }
  0xfa   : > { %v98_v42 = vadd.f32 1e-05, %v95_v38 }
  0xfb   : > { %v94_v41 = vpop.xlane.xlu2 %93 }
  0xfc   : > { %v97_v43 = vmul.f32 %v94_v41, %v2827_v13  ;;  %2606 = vrsqrt.f32 %v98_v42  ;;  %vm107_vm3 = vweird.f32 %v98_v42 }
  0xfe   : > { %v100_v44 = vadd.f32 1e-05, %v97_v43 }
  0xff   : > { %v91_v45 = vpop.xlane.xlu1 %90 }
 0x100   : > { %2608 = vrsqrt.f32 %v100_v44  ;;  %v96_v46 = vmul.f32 %v91_v45, %v2827_v13  ;;  %vm127_vm8 = vweird.f32 %v100_v44 }
 0x102   : > { %v2607_v47 = vpop.eup %2606  ;;  %v99_v48 = vadd.f32 1e-05, %v96_v46 }
 0x103   : > { %v102_v49 = vmul.f32 %v2607_v47, %v98_v42  ;;  %vm108_vm2 = vweird.f32 %v2607_v47 }
 0x104   : > { %2610 = vrsqrt.f32 %v99_v48  ;;  %vm109_vm4 = vmor %vm107_vm3, %vm108_vm2  ;;  %vm117_vm6 = vweird.f32 %v99_v48 }
 0x105   : > { %v103_v51 = vmul.f32 %v2607_v47, %v102_v49 }
 0x106   : > { %v2609_v50 = vpop.eup %2608 }
 0x107   : > { %v104_v52 = vmul.f32 0.5, %v103_v51  ;;  %v122_v53 = vmul.f32 %v2609_v50, %v100_v44  ;;  %vm128_vm9 = vweird.f32 %v2609_v50 }
 0x108   : > { %vm129_vm10 = vmor %vm127_vm8, %vm128_vm9 }
 0x109   : > { %v105_v54 = vsub.f32 1.5, %v104_v52  ;;  %v123_v58 = vmul.f32 %v2609_v50, %v122_v53 }
 0x10a   : > { %v2611_v55 = vpop.eup %2610 }
 0x10b   : > { %v106_v56 = vmul.f32 %v2607_v47, %v105_v54  ;;  %v112_v57 = vmul.f32 %v2611_v55, %v99_v48  ;;  %v124_v62 = vmul.f32 0.5, %v123_v58  ;;  %vm118_vm5 = vweird.f32 %v2611_v55 }
 0x10c   : > { %vm119_vm7 = vmor %vm117_vm6, %vm118_vm5 }
 0x10d   : > { %v113_v59 = vmul.f32 %v2611_v55, %v112_v57  ;;  %v110_v60 = vsel %vm109_vm4, %v2607_v47, %v106_v56  ;;  %v125_v4 = vsub.f32 1.5, %v124_v62 }
 0x10e   : > { %v131_v1 = vmul.f32 %v110_v60, %v2831_v18 }
 0x10f   : > { %v114_v61 = vmul.f32 0.5, %v113_v59  ;;  %v126_v9 = vmul.f32 %v2609_v50, %v125_v4 }
 0x110   : > { %v135_v7 = vmul.f32 %v134_v2, %v131_v1 }
 0x111   : > { %v115_v0 = vsub.f32 1.5, %v114_v61  ;;  %v130_v14 = vsel %vm129_vm10, %v2609_v50, %v126_v9 }
 0x112   : > { %v139_v11 = vadd.f32 %v138_v8, %v135_v7  ;;  %v133_v18 = vmul.f32 %v130_v14, %v2833_v19 }
 0x113   : > { %v116_v3 = vmul.f32 %v2611_v55, %v115_v0 }
 0x114   : > { %v137_v16 = vmul.f32 %v134_v2, %v133_v18 }
 0x115   : > { %v120_v5 = vsel %vm119_vm7, %v2611_v55, %v116_v3 }
 0x116   : > { %v132_v6 = vmul.f32 %v120_v5, %v2841_v25  ;;  %v141_v17 = vadd.f32 %v138_v8, %v137_v16 }
 0x118   : > { %v136_v10 = vmul.f32 %v134_v2, %v132_v6  ;;  %v143_v20 = vpack.c.bf16 %v141_v17, %v141_v17 }
 0x11a   : > { %v140_v12 = vadd.f32 %v138_v8, %v136_v10 }
 0x11c   : > { %v142_v15 = vpack.c.bf16 %v140_v12, %v139_v11 }
 0x11e   : > { %312 = vmatmul.bf16.vlgmr.msra.gmra.mxu0 %v142_v15  ;;  %330 = vmatmul.bf16.vlgmr.msra.gmra.mxu1 %v142_v15 }
 0x11f   : > { %348 = vmatmul.bf16.vlgmr.msra.gmra.mxu2 %v142_v15 }
 0x12e   : > { %317 = vmatmul.bf16.gmra.mxu0 %v143_v20  ;;  %335 = vmatmul.bf16.gmra.mxu1 %v143_v20 }
 0x12f   : > { %353 = vmatmul.bf16.gmra.mxu2 %v143_v20 }
 0x19b   : > { %v3002_v25 = vpop.f32.mrf.mxu0  ;;  %v3004_v21 = vpop.f32.mrf.mxu1 }
 0x1a2   : > { %v3006_v22 = vpop.f32.mrf.mxu2 }
 0x1a3   : > { %v3008_v23 = vpop.f32.mrf.mxu0  ;;  %v3010_v24 = vpop.f32.mrf.mxu1 }
 0x1a4   : > { %2248 = vmatpush.xpose.msk.msra.mxu3 %vm358_vm11, %v3010_v24  ;;  %v457_v29 = vrot.slane %v3010_v24, 1  ;;  %v453_v51 = vrot.slane %v3008_v23, 1 }
 0x1a8   : > { %2249 = vmatpush.xpose.msk.msra.mxu3 %vm358_vm11, %v3004_v21 }
 0x1aa   : > { %v3016_v19 = vpop.f32.mrf.mxu2 }
 0x1ab   : > { %v318_v26 = vpop.f32.mrf.mxu0  ;;  %v336_v27 = vpop.f32.mrf.mxu1  ;;  %2250 = vmatmul.msk.f32.vlgmr.msra.gmra.mxu3 %vm358_vm11, %v3002_v25  ;;  %v514_v59 = vrot.slane %v3016_v19, 1 }
 0x1ac   : > { %2252 = vmatpush.msk.msrb.mxu3 %vm424_vm12, %v3016_v19  ;;  %v3020_v28 = vrot.slane %v336_v27, 1  ;;  %v3042_v39 = vrot.slane %v318_v26, 1 }
 0x1ae   : > { %443 = vmatpush.msrb.mxu3 %v3006_v22  ;;  %v3030_v30 = vsel %vm452_vm13, %v457_v29, %v3020_v28  ;;  %v3062_v52 = vsel %vm452_vm13, %v453_v51, %v3042_v39 }
 0x1b0   : > { %2255 = vmatpush.xpose.msk.msra.mxu3 %vm358_vm11, %v3020_v28 }
 0x1b2   : > { %v354_v31 = vpop.f32.mrf.mxu2 }
 0x1b3   : > { %v320_v32 = vpop.f32.mrf.mxu0  ;;  %v338_v33 = vpop.f32.mrf.mxu1  ;;  %2251 = vmatmul.msk.f32.gmra.mxu3 %vm358_vm11, %v3008_v23  ;;  %v3080_v55 = vrot.slane %v354_v31, 1 }
 0x1b4   : > { %2256 = vmatpush.xpose.msk.msra.mxu3 %vm358_vm11, %v3030_v30 }
 0x1b5   : > { %v3089_v60 = vsel %vm452_vm13, %v514_v59, %v3080_v55 }
 0x1ba   : > { %v356_v34 = vpop.f32.mrf.mxu2 }
 0x22e   : > { %v388_v35 = vpop.f32.mrf.mxu3 }
 0x22f   : > { %v395_v36 = vsel %vm394_vm14, %v388_v35, -inf }
 0x230   : > { %396 = vmax.xlane.f32.xlu0 %v395_v36 }
 0x236   : > { %v391_v37 = vpop.f32.mrf.mxu3 }
 0x237   : > { %v399_v38 = vsel %vm398_vm15, %v391_v37, -inf }
 0x238   : > { %400 = vmax.xlane.f32.xlu1 %v399_v38 }
 0x251   : > { %569 = vrot.lane.b32.xlu1 %v3010_v24, %s2738_s29 }
 0x259   : > { %563 = vrot.lane.b32.xlu1 %v3002_v25, %s2738_s29 }
 0x261   : > { %663 = vrot.lane.b32.xlu1 %v3042_v39, %s2738_s29 }
 0x269   : > { %844 = vrot.lane.b32.xlu1 %v3002_v25, %s2739_s30 }
 0x271   : > { %945 = vrot.lane.b32.xlu1 %v3030_v30, %s2739_s30 }
 0x2a3   : > { %v397_v40 = vpop.xlane.xlu0 %396 }
 0x2a4   : > { %v402_v41 = vsub.f32 %v388_v35, %v397_v40 }
 0x2a6   : > { %v404_v42 = vmul.f32 1.442695, %v402_v41 }
 0x2a8   : > { %2612 = vpow2.f32 %v404_v42 }
 0x2ab   : > { %v401_v43 = vpop.xlane.xlu1 %400 }
 0x2ac   : > { %v403_v44 = vsub.f32 %v391_v37, %v401_v43 }
 0x2ae   : > { %v2613_v45 = vpop.eup %2612  ;;  %v406_v46 = vmul.f32 1.442695, %v403_v44 }
 0x2af   : > { %v408_v47 = vsel %vm394_vm14, %v2613_v45, 0.0 }
 0x2b0   : > { %2614 = vpow2.f32 %v406_v46  ;;  %409 = vadd.xlane.f32.xlu2 %v408_v47 }
 0x2b6   : > { %v2615_v48 = vpop.eup %2614 }
 0x2b7   : > { %v411_v49 = vsel %vm398_vm15, %v2615_v48, 0.0 }
 0x2b8   : > { %412 = vadd.xlane.f32.xlu0 %v411_v49 }
 0x2c3   : > { %v570_v50 = vpop.permute.xlu1 %569 }
 0x2c4   : > { %2262 = vmatpush.xpose.msk.msrb.mxu0 %vm358_vm11, %v570_v50 }
 0x2c8   : > { %667 = vrot.lane.b32.xlu2 %v3020_v28, %s2738_s29 }
 0x2cb   : > { %v564_v0 = vpop.permute.xlu1 %563 }
 0x2cc   : > { %567 = vrot.lane.b32.xlu0 %v3004_v21, %s2738_s29 }
 0x2d0   : > { %665 = vrot.lane.b32.xlu2 %v3030_v30, %s2738_s29 }
 0x2d3   : > { %v664_v3 = vpop.permute.xlu1 %663 }
 0x2d4   : > { %661 = vrot.lane.b32.xlu0 %v3062_v52, %s2738_s29 }
 0x2d8   : > { %565 = vrot.lane.b32.xlu2 %v3008_v23, %s2738_s29 }
 0x2db   : > { %v845_v6 = vpop.permute.xlu1 %844 }
 0x2dc   : > { %850 = vrot.lane.b32.xlu0 %v3010_v24, %s2739_s30 }
 0x2e0   : > { %848 = vrot.lane.b32.xlu2 %v3004_v21, %s2739_s30 }
 0x2e3   : > { %v946_v9 = vpop.permute.xlu1 %945 }
 0x2e4   : > { %846 = vrot.lane.b32.xlu0 %v3008_v23, %s2739_s30 }
 0x2e8   : > { %947 = vrot.lane.b32.xlu2 %v3020_v28, %s2739_s30 }
 0x2ec   : > { %941 = vrot.lane.b32.xlu0 %v3062_v52, %s2739_s30 }
 0x2f0   : > { %943 = vrot.lane.b32.xlu2 %v3042_v39, %s2739_s30 }
 0x323   : > { %v410_v53 = vpop.xlane.xlu2 %409 }
 0x324   : > { %2616 = vrcp.f32 %v410_v53 }
 0x32a   : > { %v2617_v54 = vpop.eup %2616 }
 0x32b   : > { %v668_v56 = vpop.permute.xlu2 %667  ;;  %v413_v57 = vpop.xlane.xlu0 %412  ;;  %v416_v58 = vmul.f32 %v2617_v54, %v2613_v45 }
 0x32c   : > { %2618 = vrcp.f32 %v413_v57  ;;  %2269 = vmatpush.xpose.msk.msrb.mxu2 %vm358_vm11, %v668_v56 }
 0x32d   : > { %2253 = vmatmul.msk.f32.vlgmr.msrb.gmra.mxu3 %vm394_vm14, %v416_v58 }
 0x32e   : > { %2259 = vmatpush.msk.msrb.mxu3 %vm424_vm12, %v3080_v55 }
 0x330   : > { %541 = vmatpush.msrb.mxu3 %v3089_v60 }
 0x332   : > { %v2619_v61 = vpop.eup %2618 }
 0x333   : > { %v666_v62 = vpop.permute.xlu2 %665  ;;  %v417_v63 = vmul.f32 %v2619_v61, %v2615_v48 }
 0x334   : > { %2270 = vmatpush.xpose.msk.msrb.mxu2 %vm358_vm11, %v666_v62 }
 0x335   : > { %2254 = vmatmul.msk.f32.gmra.mxu3 %vm394_vm14, %v417_v63 }
 0x33b   : > { %v566_v2 = vpop.permute.xlu2 %565 }
 0x33d   : > { %2257 = vmatmul.msk.f32.vlgmr.msra.gmra.mxu3 %vm358_vm11, %v3062_v52 }
 0x33e   : > { %v568_v1 = vpop.permute.xlu0 %567 }
 0x33f   : > { %2263 = vmatpush.xpose.msk.msrb.mxu0 %vm358_vm11, %v568_v1 }
 0x342   : > { %2264 = vmatmul.msk.f32.vlgmr.msrb.gmra.mxu0 %vm358_vm11, %v564_v0 }
 0x343   : > { %v849_v5 = vpop.permute.xlu2 %848 }
 0x345   : > { %2258 = vmatmul.msk.f32.gmra.mxu3 %vm358_vm11, %v3042_v39 }
 0x346   : > { %v662_v4 = vpop.permute.xlu0 %661 }
 0x347   : > { %2271 = vmatmul.msk.f32.vlgmr.msrb.gmra.mxu2 %vm358_vm11, %v662_v4 }
 0x34a   : > { %2265 = vmatmul.msk.f32.gmra.mxu0 %vm358_vm11, %v566_v2 }
 0x34b   : > { %v948_v8 = vpop.permute.xlu2 %947 }
 0x34e   : > { %v851_v7 = vpop.permute.xlu0 %850 }
 0x34f   : > { %2272 = vmatmul.msk.f32.gmra.mxu2 %vm358_vm11, %v664_v3 }
 0x350   : > { %2296 = vmatpush.xpose.msk.msra.mxu2 %vm358_vm11, %v851_v7 }
 0x353   : > { %v944_v12 = vpop.permute.xlu2 %943 }
 0x354   : > { %2297 = vmatpush.xpose.msk.msra.mxu2 %vm358_vm11, %v849_v5 }
 0x356   : > { %v847_v10 = vpop.permute.xlu0 %846 }
 0x357   : > { %2298 = vmatmul.msk.f32.vlgmr.msra.gmra.mxu2 %vm358_vm11, %v845_v6 }
 0x358   : > { %2303 = vmatpush.xpose.msk.msrb.mxu2 %vm358_vm11, %v948_v8 }
 0x35c   : > { %2304 = vmatpush.xpose.msk.msrb.mxu2 %vm358_vm11, %v946_v9 }
 0x35e   : > { %v942_v11 = vpop.permute.xlu0 %941 }
 0x35f   : > { %2299 = vmatmul.msk.f32.gmra.mxu2 %vm358_vm11, %v847_v10 }
 0x367   : > { %2305 = vmatmul.msk.f32.vlgmr.msrb.gmra.mxu2 %vm358_vm11, %v942_v11 }
 0x36f   : > { %2306 = vmatmul.msk.f32.gmra.mxu2 %vm358_vm11, %v944_v12 }
 0x3b0   : > { %v3111_v14 = vpop.f32.mrf.mxu3 }
 0x3b8   : > { %v3113_v15 = vpop.f32.mrf.mxu3 }
 0x3bf   : > { %v3131_v41 = vpop.f32.mrf.mxu0 }
 0x3c0   : > { %v485_v18 = vpop.f32.mrf.mxu3 }
 0x3c1   : > { %v491_v16 = vsel %vm394_vm14, %v485_v18, -inf }
 0x3c2   : > { %492 = vmax.xlane.f32.xlu1 %v491_v16 }
 0x3c7   : > { %v599_v48 = vpop.f32.mrf.mxu0 }
 0x3c8   : > { %v488_v17 = vpop.f32.mrf.mxu3  ;;  %v605_v53 = vsel %vm398_vm15, %v599_v48, -inf }
 0x3c9   : > { %v494_v20 = vsel %vm398_vm15, %v488_v17, -inf }
 0x3ca   : > { %v694_v26 = vpop.f32.mrf.mxu2  ;;  %495 = vmax.xlane.f32.xlu0 %v494_v20 }
 0x3cb   : > { %v700_v27 = vsel %vm394_vm14, %v694_v26, -inf }
 0x3d2   : > { %v3118_v29 = vpop.f32.mrf.mxu2  ;;  %701 = vmax.xlane.f32.xlu0 %v700_v27 }
 0x3d3   : > { %v703_v58 = vsel %vm398_vm15, %v3118_v29, -inf }
 0x3da   : > { %v877_v31 = vpop.f32.mrf.mxu2 }
 0x3db   : > { %v883_v32 = vsel %vm394_vm14, %v877_v31, -inf }
 0x3dc   : > { %884 = vmax.xlane.f32.xlu0 %v883_v32 }
 0x3e2   : > { %v3121_v33 = vpop.f32.mrf.mxu2 }
 0x3e3   : > { %v886_v59 = vsel %vm398_vm15, %v3121_v33, -inf }
 0x3ea   : > { %v3123_v34 = vpop.f32.mrf.mxu2 }
 0x3eb   : > { %v980_v63 = vsel %vm394_vm14, %v3123_v34, -inf }
 0x3f2   : > { %v3125_v35 = vpop.f32.mrf.mxu2 }
 0x3f3   : > { %v983_v36 = vsel %vm398_vm15, %v3125_v35, -inf }
 0x3f4   : > { %984 = vmax.xlane.f32.xlu0 %v983_v36 }
 0x408   : > { %724 = vrot.lane.b32.xlu0 %v3080_v55, %s2738_s29 }
 0x435   : > { %v493_v37 = vpop.xlane.xlu1 %492 }
 0x436   : > { %v497_v38 = vsub.f32 %v485_v18, %v493_v37 }
 0x438   : > { %v499_v40 = vmul.f32 1.442695, %v497_v38 }
 0x43a   : > { %2620 = vpow2.f32 %v499_v40 }
 0x43d   : > { %v496_v42 = vpop.xlane.xlu0 %495 }
 0x43e   : > { %v498_v43 = vsub.f32 %v488_v17, %v496_v42 }
 0x440   : > { %v2621_v44 = vpop.eup %2620  ;;  %v501_v45 = vmul.f32 1.442695, %v498_v43 }
 0x441   : > { %v503_v46 = vsel %vm394_vm14, %v2621_v44, 0.0 }
 0x442   : > { %2622 = vpow2.f32 %v501_v45  ;;  %504 = vadd.xlane.f32.xlu2 %v503_v46 }
 0x445   : > { %v702_v47 = vpop.xlane.xlu0 %701 }
 0x446   : > { %v706_v50 = vsub.f32 %v694_v26, %v702_v47  ;;  %v2597_v26 = vpack.i.bf16 %v3006_v22, %v3089_v60 }
 0x448   : > { %v2623_v49 = vpop.eup %2622  ;;  %v708_v54 = vmul.f32 1.442695, %v706_v50 }
 0x449   : > { %v506_v51 = vsel %vm398_vm15, %v2623_v49, 0.0 }
 0x44a   : > { %507 = vadd.xlane.f32.xlu1 %v506_v51  ;;  %606 = vmax.xlane.f32.xlu2 %v605_v53  ;;  %2624 = vpow2.f32 %v708_v54 }
 0x44f   : > { %v885_v56 = vpop.xlane.xlu0 %884 }
 0x450   : > { %v889_v57 = vsub.f32 %v877_v31, %v885_v56  ;;  %v3140_v62 = vpop.eup %2624 }
 0x451   : > { %v712_v0 = vsel %vm394_vm14, %v3140_v62, 0.0 }
 0x452   : > { %v891_v61 = vmul.f32 1.442695, %v889_v57  ;;  %704 = vmax.xlane.f32.xlu1 %v703_v58  ;;  %887 = vmax.xlane.f32.xlu2 %v886_v59  ;;  %v2535_v58 = vld [vmem:[%s3753_s3 + $0x8] sm:$0xff] }
 0x454   : > { %2626 = vpow2.f32 %v891_v61 }
 0x45a   : > { %v3146_v1 = vpop.eup %2626  ;;  %981 = vmax.xlane.f32.xlu1 %v980_v63  ;;  %713 = vadd.xlane.f32.xlu2 %v712_v0  ;;  %v2534_v0 = vld [vmem:[%s3753_s3] sm:$0xff] }
 0x45b   : > { %v895_v2 = vsel %vm394_vm14, %v3146_v1, 0.0 }
 0x45c   : > { %896 = vadd.xlane.f32.xlu0 %v895_v2 }
 0x467   : > { %v985_v3 = vpop.xlane.xlu0 %984 }
 0x468   : > { %v987_v36 = vsub.f32 %v3125_v35, %v985_v3 }
 0x46a   : > { %v990_v38 = vmul.f32 1.442695, %v987_v36 }
 0x470   : > { %1004 = vrot.lane.b32.xlu0 %v3080_v55, %s2739_s30 }
 0x478   : > { %1002 = vrot.lane.b32.xlu0 %v3089_v60, %s2739_s30 }
 0x47a   : > { %v725_v4 = vpop.permute.xlu0 %724 }
 0x47b   : > { %2273 = vmatpush.msk.msra.mxu3 %vm424_vm12, %v725_v4 }
 0x480   : > { %1194 = vrot.lane.b32.xlu0 %v3020_v28, %s2740_s0 }
 0x488   : > { %1091 = vrot.lane.b32.xlu0 %v3002_v25, %s2740_s0 }
 0x490   : > { %1192 = vrot.lane.b32.xlu0 %v3030_v30, %s2740_s0 }
 0x498   : > { %1190 = vrot.lane.b32.xlu0 %v3042_v39, %s2740_s0 }
 0x4b5   : > { %v505_v5 = vpop.xlane.xlu2 %504 }
 0x4b6   : > { %2628 = vrcp.f32 %v505_v5 }
 0x4bc   : > { %v2629_v6 = vpop.eup %2628 }
 0x4bd   : > { %v511_v7 = vmul.f32 %v2629_v6, %v2621_v44  ;;  %v508_v8 = vpop.xlane.xlu1 %507  ;;  %v607_v9 = vpop.xlane.xlu2 %606  ;;  %v602_v6 = vsel %vm394_vm14, %v3131_v41, -inf }
 0x4be   : > { %2630 = vrcp.f32 %v508_v8  ;;  %v609_v10 = vsub.f32 %v599_v48, %v607_v9 }
 0x4bf   : > { %2260 = vmatmul.msk.f32.vlgmr.msrb.gmra.mxu3 %vm394_vm14, %v511_v7 }
 0x4c0   : > { %v612_v28 = vmul.f32 1.442695, %v609_v10 }
 0x4c2   : > { %2632 = vpow2.f32 %v612_v28 }
 0x4c4   : > { %v2631_v11 = vpop.eup %2630 }
 0x4c5   : > { %v705_v25 = vpop.xlane.xlu1 %704  ;;  %v512_v12 = vmul.f32 %v2631_v11, %v2623_v49  ;;  %v888_v27 = vpop.xlane.xlu2 %887 }
 0x4c6   : > { %v707_v30 = vsub.f32 %v3118_v29, %v705_v25  ;;  %v890_v29 = vsub.f32 %v3121_v33, %v888_v27 }
 0x4c7   : > { %2261 = vmatmul.msk.f32.gmra.mxu3 %vm394_vm14, %v512_v12 }
 0x4c8   : > { %v2633_v39 = vpop.eup %2632  ;;  %v710_v18 = vmul.f32 1.442695, %v707_v30  ;;  %v893_v31 = vmul.f32 1.442695, %v890_v29 }
 0x4c9   : > { %v617_v16 = vsel %vm398_vm15, %v2633_v39, 0.0 }
 0x4ca   : > { %2634 = vpow2.f32 %v710_v18  ;;  %618 = vadd.xlane.f32.xlu1 %v617_v16 }
 0x4cb   : > { %2636 = vpow2.f32 %v893_v31 }
 0x4cc   : > { %2638 = vpow2.f32 %v990_v38 }
 0x4cd   : > { %v982_v32 = vpop.xlane.xlu1 %981  ;;  %v714_v45 = vpop.xlane.xlu2 %713 }
 0x4ce   : > { %v986_v37 = vsub.f32 %v3123_v34, %v982_v32 }
 0x4cf   : > { %v897_v46 = vpop.xlane.xlu0 %896 }
 0x4d0   : > { %v2635_v17 = vpop.eup %2634  ;;  %v988_v42 = vmul.f32 1.442695, %v986_v37 }
 0x4d1   : > { %v715_v20 = vsel %vm398_vm15, %v2635_v17, 0.0  ;;  %v3180_v40 = vpop.eup %2636 }
 0x4d2   : > { %716 = vadd.xlane.f32.xlu2 %v715_v20  ;;  %v898_v43 = vsel %vm398_vm15, %v3180_v40, 0.0  ;;  %2640 = vpow2.f32 %v988_v42  ;;  %v3184_v44 = vpop.eup %2638 }
 0x4d3   : > { %v995_v35 = vsel %vm398_vm15, %v3184_v44, 0.0  ;;  %2642 = vrcp.f32 %v714_v45 }
 0x4d8   : > { %v3186_v33 = vpop.eup %2640 }
 0x4d9   : > { %v992_v34 = vsel %vm394_vm14, %v3186_v33, 0.0  ;;  %v2643_v50 = vpop.eup %2642 }
 0x4da   : > { %v720_v53 = vmul.f32 %v2643_v50, %v3140_v62 }
 0x4e2   : > { %v1005_v48 = vpop.permute.xlu0 %1004 }
 0x4e3   : > { %627 = vrot.lane.b32.xlu1 %v3016_v19, %s2738_s29 }
 0x4ea   : > { %2598 = vrot.lane.b32.xlu2 %v2597_v26, %s2738_s29 }
 0x4eb   : > { %907 = vrot.lane.b32.xlu1 %v3016_v19, %s2739_s30 }
 0x4f3   : > { %905 = vrot.lane.b32.xlu1 %v3006_v22, %s2739_s30 }
 0x513   : > { %899 = vadd.xlane.f32.xlu2 %v898_v43 }
 0x51b   : > { %996 = vadd.xlane.f32.xlu2 %v995_v35 }
 0x51d   : > { %993 = vadd.xlane.f32.xlu1 %v992_v34 }
 0x533   : > { %1097 = vrot.lane.b32.xlu2 %v3010_v24, %s2740_s0 }
 0x536   : > { %1095 = vrot.lane.b32.xlu1 %v3004_v21, %s2740_s0  ;;  %v1003_v21 = vpop.permute.xlu0 %1002 }
 0x53b   : > { %1188 = vrot.lane.b32.xlu2 %v3062_v52, %s2740_s0 }
 0x53d   : > { %v619_v49 = vpop.xlane.xlu1 %618 }
 0x53e   : > { %1093 = vrot.lane.b32.xlu1 %v3008_v23, %s2740_s0  ;;  %2644 = vrcp.f32 %v619_v49  ;;  %v1195_v63 = vpop.permute.xlu0 %1194 }
 0x542   : > { %v543_v56 = vpop.f32.mrf.mxu3 }
 0x543   : > { %v551_v62 = vrot.slane %v543_v56, 7 }
 0x544   : > { %v2645_v52 = vpop.eup %2644 }
 0x545   : > { %v717_v47 = vpop.xlane.xlu2 %716  ;;  %v623_v59 = vmul.f32 %v2645_v52, %v2633_v39  ;;  %v556_v2 = vsel %vm424_vm12, %v3113_v15, %v551_v62 }
 0x546   : > { %2646 = vrcp.f32 %v717_v47  ;;  %v557_v4 = vpack.c.bf16 %v556_v2, %v3111_v14  ;;  %v1092_v7 = vpop.permute.xlu0 %1091 }
 0x547   : > { %2648 = vrcp.f32 %v897_v46 }
 0x54a   : > { %v546_v9 = vpop.f32.mrf.mxu3 }
 0x54b   : > { %v552_v15 = vrot.slane %v546_v9, 7 }
 0x54c   : > { %v2647_v54 = vpop.eup %2646 }
 0x54d   : > { %v2599_v51 = vpop.permute.xlu2 %2598  ;;  %v721_v61 = vmul.f32 %v2647_v54, %v2635_v17  ;;  %v2649_v5 = vpop.eup %2648  ;;  %v553_v14 = vsel %vm424_vm12, %v551_v62, %v552_v15 }
 0x54e   : > { %v2600_v24 = vunpack.i.l.bf16 %v2599_v51  ;;  %v2601_v23 = vunpack.i.h.bf16 %v2599_v51  ;;  %v903_v8 = vmul.f32 %v2649_v5, %v3146_v1  ;;  %v1193_v28 = vpop.permute.xlu0 %1192  ;;  %v558_v11 = vpack.c.bf16 %v553_v14, %v553_v14 }
 0x550   : > { %750 = vmatpush.msra.mxu3 %v2600_v24 }
 0x551   : > { %2274 = vmatmul.msk.f32.vlgmr.msra.gmra.mxu3 %vm394_vm14, %v720_v53 }
 0x555   : > { %v628_v57 = vpop.permute.xlu1 %627 }
 0x556   : > { %2266 = vmatpush.msk.msra.mxu0 %vm424_vm12, %v628_v57  ;;  %2582 = vmatpush.msk.msrb.mxu1 %vm424_vm12, %v628_v57  ;;  %v1191_v31 = vpop.permute.xlu0 %1190 }
 0x558   : > { %653 = vmatpush.msra.mxu0 %v2601_v23  ;;  %2583 = vmatpush.msrb.mxu1 %v2601_v23 }
 0x559   : > { %2268 = vmatmul.msk.f32.vlgmr.msrb.gmra.mxu1 %vm394_vm14, %v623_v59  ;;  %2275 = vmatmul.msk.f32.gmra.mxu3 %vm394_vm14, %v721_v61 }
 0x55a   : > { %832 = vmatpush.bf16.msra.mxu1 %v2535_v58 }
 0x55d   : > { %v908_v3 = vpop.permute.xlu1 %907 }
 0x55e   : > { %833 = vmatpush.bf16.msra.mxu1 %v2534_v0  ;;  %2300 = vmatpush.msk.msrb.mxu3 %vm424_vm12, %v908_v3 }
 0x561   : > { %2294 = vmatmul.msk.bf16.vlgmr.msra.gmra.mxu1 %vm358_vm11, %v557_v4 }
 0x564   : > { %603 = vmax.xlane.f32.xlu2 %v602_v6 }
 0x565   : > { %v906_v10 = vpop.permute.xlu1 %905 }
 0x566   : > { %933 = vmatpush.msrb.mxu3 %v906_v10 }
 0x567   : > { %2301 = vmatmul.msk.f32.vlgmr.msrb.gmra.mxu3 %vm394_vm14, %v903_v8 }
 0x568   : > { %2307 = vmatpush.msk.msra.mxu3 %vm424_vm12, %v1005_v48 }
 0x56a   : > { %1030 = vmatpush.msra.mxu3 %v1003_v21 }
 0x56c   : > { %2327 = vmatpush.xpose.msk.msrb.mxu3 %vm358_vm11, %v1195_v63 }
 0x570   : > { %2328 = vmatpush.xpose.msk.msrb.mxu3 %vm358_vm11, %v1193_v28 }
 0x571   : > { %2295 = vmatmul.msk.bf16.gmra.mxu1 %vm358_vm11, %v558_v11 }
 0x586   : > { %v900_v1 = vpop.xlane.xlu2 %899 }
 0x587   : > { %2650 = vrcp.f32 %v900_v1 }
 0x58d   : > { %v2651_v25 = vpop.eup %2650 }
 0x58e   : > { %v997_v12 = vpop.xlane.xlu2 %996  ;;  %v904_v30 = vmul.f32 %v2651_v25, %v3180_v40 }
 0x590   : > { %v994_v39 = vpop.xlane.xlu1 %993  ;;  %2302 = vmatmul.msk.f32.gmra.mxu3 %vm394_vm14, %v904_v30 }
 0x591   : > { %2652 = vrcp.f32 %v994_v39 }
 0x592   : > { %2654 = vrcp.f32 %v997_v12 }
 0x596   : > { %v1098_v18 = vpop.permute.xlu2 %1097 }
 0x597   : > { %v2653_v16 = vpop.eup %2652  ;;  %2320 = vmatpush.xpose.msk.msrb.mxu1 %vm358_vm11, %v1098_v18 }
 0x598   : > { %v1000_v17 = vmul.f32 %v2653_v16, %v3186_v33  ;;  %v2655_v20 = vpop.eup %2654 }
 0x599   : > { %v1001_v26 = vmul.f32 %v2655_v20, %v3184_v44 }
 0x59a   : > { %2308 = vmatmul.msk.f32.vlgmr.msra.gmra.mxu3 %vm394_vm14, %v1000_v17 }
 0x59e   : > { %v1189_v29 = vpop.permute.xlu2 %1188 }
 0x5a2   : > { %2309 = vmatmul.msk.f32.gmra.mxu3 %vm394_vm14, %v1001_v26 }
 0x5a8   : > { %v1096_v27 = vpop.permute.xlu1 %1095 }
 0x5a9   : > { %2321 = vmatpush.xpose.msk.msrb.mxu1 %vm358_vm11, %v1096_v27  ;;  %v2537_v27 = vld [vmem:[%s3753_s3 + $0x18] sm:$0xff] }
 0x5aa   : > { %2329 = vmatmul.msk.f32.vlgmr.msrb.gmra.mxu3 %vm358_vm11, %v1189_v29  ;;  %796 = vmatpush.bf16.msrb.mxu0 %v2537_v27 }
 0x5ac   : > { %2322 = vmatmul.msk.f32.vlgmr.msrb.gmra.mxu1 %vm358_vm11, %v1092_v7 }
 0x5b0   : > { %v1094_v32 = vpop.permute.xlu1 %1093 }
 0x5b2   : > { %2330 = vmatmul.msk.f32.gmra.mxu3 %vm358_vm11, %v1191_v31 }
 0x5b4   : > { %2323 = vmatmul.msk.f32.gmra.mxu1 %vm358_vm11, %v1094_v32  ;;  %v2538_v32 = vld [vmem:[%s3753_s3 + $0x20] sm:$0xff] }
 0x5d4   : > { %v752_v36 = vpop.f32.mrf.mxu3 }
 0x5d5   : > { %v760_v37 = vrot.slane %v752_v36, 7 }
 0x5d6   : > { %v658_v38 = vpop.f32.mrf.mxu1 }
 0x5d7   : > { %v3239_v40 = vsel %vm424_vm12, %v658_v38, %v760_v37  ;;  %v604_v49 = vpop.xlane.xlu2 %603 }
 0x5d8   : > { %v608_v24 = vsub.f32 %v3131_v41, %v604_v49 }
 0x5da   : > { %v610_v21 = vmul.f32 1.442695, %v608_v24 }
 0x5dc   : > { %v755_v42 = vpop.f32.mrf.mxu3  ;;  %2656 = vpow2.f32 %v610_v21 }
 0x5dd   : > { %v761_v43 = vrot.slane %v755_v42, 7 }
 0x5de   : > { %v3241_v44 = vpop.f32.mrf.mxu1 }
 0x5df   : > { %v3244_v33 = vsel %vm424_vm12, %v760_v37, %v761_v43 }
 0x5e2   : > { %v2657_v61 = vpop.eup %2656 }
 0x5e3   : > { %v614_v62 = vsel %vm394_vm14, %v2657_v61, 0.0 }
 0x5e6   : > { %v3246_v35 = vpop.f32.mrf.mxu1 }
 0x5ea   : > { %v3250_v46 = vpop.f32.mrf.mxu3 }
 0x5ee   : > { %v3248_v34 = vpop.f32.mrf.mxu1 }
 0x5f6   : > { %v842_v45 = vpop.f32.mrf.mxu1 }
 0x613   : > { %v938_v47 = vpop.f32.mrf.mxu3 }
 0x61d   : > { %v1032_v48 = vpop.f32.mrf.mxu3 }
 0x61e   : > { %v1040_v50 = vrot.slane %v1032_v48, 7 }
 0x620   : > { %v3253_v51 = vsel %vm424_vm12, %v938_v47, %v1040_v50 }
 0x621   : > { %v1046_v53 = vpack.c.bf16 %v3253_v51, %v3250_v46  ;;  %v2540_v46 = vld [vmem:[%s3753_s3 + $0x30] sm:$0xff] }
 0x625   : > { %v1035_v52 = vpop.f32.mrf.mxu3 }
 0x626   : > { %v1041_v54 = vrot.slane %v1035_v52, 7  ;;  %v767_v52 = vpack.c.bf16 %v3244_v33, %v3244_v33  ;;  %v2541_v33 = vld [vmem:[%s3753_s3 + $0x38] sm:$0xff] }
 0x628   : > { %v3259_v56 = vsel %vm424_vm12, %v1040_v50, %v1041_v54 }
 0x629   : > { %v1124_v57 = vpop.f32.mrf.mxu1  ;;  %v1047_v54 = vpack.c.bf16 %v3259_v56, %v3259_v56 }
 0x62a   : > { %v1130_v23 = vsel %vm394_vm14, %v1124_v57, -inf }
 0x62b   : > { %1131 = vmax.xlane.f32.xlu1 %v1130_v23 }
 0x62d   : > { %v1221_v58 = vpop.f32.mrf.mxu3 }
 0x62e   : > { %v1227_v59 = vsel %vm394_vm14, %v1221_v58, -inf }
 0x62f   : > { %1228 = vmax.xlane.f32.xlu2 %v1227_v59 }
 0x631   : > { %v1127_v41 = vpop.f32.mrf.mxu1 }
 0x632   : > { %v1133_v63 = vsel %vm398_vm15, %v1127_v41, -inf }
 0x633   : > { %615 = vadd.xlane.f32.xlu1 %v614_v62  ;;  %1134 = vmax.xlane.f32.xlu0 %v1133_v63 }
 0x635   : > { %v1224_v0 = vpop.f32.mrf.mxu3 }
 0x636   : > { %v1230_v2 = vsel %vm398_vm15, %v1224_v0, -inf }
 0x63b   : > { %1231 = vmax.xlane.f32.xlu0 %v1230_v2 }
 0x64c   : > { %1154 = vrot.lane.b32.xlu1 %v3016_v19, %s2740_s0 }
 0x654   : > { %1249 = vrot.lane.b32.xlu1 %v3089_v60, %s2740_s0 }
 0x69e   : > { %v1132_v3 = vpop.xlane.xlu1 %1131 }
 0x69f   : > { %v1136_v4 = vsub.f32 %v1124_v57, %v1132_v3 }
 0x6a1   : > { %v1138_v5 = vmul.f32 1.442695, %v1136_v4 }
 0x6a2   : > { %v1229_v6 = vpop.xlane.xlu2 %1228 }
 0x6a3   : > { %2658 = vpow2.f32 %v1138_v5  ;;  %v1233_v7 = vsub.f32 %v1221_v58, %v1229_v6 }
 0x6a5   : > { %v1235_v8 = vmul.f32 1.442695, %v1233_v7 }
 0x6a6   : > { %v616_v9 = vpop.xlane.xlu1 %615  ;;  %v1135_v10 = vpop.xlane.xlu0 %1134 }
 0x6a7   : > { %2660 = vpow2.f32 %v1235_v8  ;;  %v1137_v15 = vsub.f32 %v1127_v41, %v1135_v10 }
 0x6a8   : > { %2662 = vrcp.f32 %v616_v9 }
 0x6a9   : > { %v2659_v14 = vpop.eup %2658  ;;  %v1140_v28 = vmul.f32 1.442695, %v1137_v15 }
 0x6aa   : > { %v1142_v11 = vsel %vm394_vm14, %v2659_v14, 0.0 }
 0x6ab   : > { %1143 = vadd.xlane.f32.xlu2 %v1142_v11  ;;  %2664 = vpow2.f32 %v1140_v28 }
 0x6ad   : > { %v2661_v19 = vpop.eup %2660 }
 0x6ae   : > { %v2663_v60 = vpop.eup %2662  ;;  %v1239_v1 = vsel %vm394_vm14, %v2661_v19, 0.0  ;;  %v1232_v18 = vpop.xlane.xlu0 %1231 }
 0x6af   : > { %v622_v25 = vmul.f32 %v2663_v60, %v2657_v61  ;;  %1240 = vadd.xlane.f32.xlu0 %v1239_v1  ;;  %v1234_v16 = vsub.f32 %v1224_v0, %v1232_v18  ;;  %v2694_v1 = vld [vmem:[#allocation2 + $0x10] sm:$0xff] }
 0x6b1   : > { %2267 = vmatmul.msk.f32.vlgmr.msra.gmra.mxu0 %vm394_vm14, %v622_v25  ;;  %v2665_v12 = vpop.eup %2664  ;;  %v1237_v17 = vmul.f32 1.442695, %v1234_v16 }
 0x6b2   : > { %v1145_v30 = vsel %vm398_vm15, %v2665_v12, 0.0 }
 0x6b3   : > { %2666 = vpow2.f32 %v1237_v17 }
 0x6b7   : > { %1146 = vadd.xlane.f32.xlu0 %v1145_v30 }
 0x6b9   : > { %v2667_v20 = vpop.eup %2666 }
 0x6ba   : > { %v1242_v26 = vsel %vm398_vm15, %v2667_v20, 0.0 }
 0x6be   : > { %v1155_v39 = vpop.permute.xlu1 %1154 }
 0x6bf   : > { %2324 = vmatpush.msk.msra.mxu2 %vm424_vm12, %v1155_v39  ;;  %v2695_v39 = vld [vmem:[#allocation2] sm:$0xff] }
 0x6c3   : > { %1152 = vrot.lane.b32.xlu2 %v3006_v22, %s2740_s0  ;;  %v2536_v22 = vld [vmem:[%s3753_s3 + $0x10] sm:$0xff] }
 0x6c4   : > { %797 = vmatpush.bf16.msrb.mxu0 %v2536_v22 }
 0x6c6   : > { %v1250_v24 = vpop.permute.xlu1 %1249 }
 0x6cb   : > { %1251 = vrot.lane.b32.xlu0 %v3080_v55, %s2740_s0  ;;  %v2539_v55 = vld [vmem:[%s3753_s3 + $0x28] sm:$0xff]  ;;  %s2741_s0 = smov (%p54_p0), [#allocation3]  }
 0x6cc   : > { %1076 = vmatpush.bf16.msra.mxu0 %v2539_v55  ;;  %s2133_s15 = sshll.u32 (%p54_p0), %s2741_s0, 4  ;;  %s2134_s15 = int_to_ptr.vmem [resolvable:$true] %s2133_s15 }
 0x6d0   : > { %1077 = vmatpush.bf16.msra.mxu0 %v2538_v32 }
 0x6ec   : > { %1243 = vadd.xlane.f32.xlu2 %v1242_v26  ;;  %v2696_v26 = vld [vmem:[#allocation2 + $0x8] sm:$0x3] }
 0x71e   : > { %v1144_v29 = vpop.xlane.xlu2 %1143 }
 0x71f   : > { %2668 = vrcp.f32 %v1144_v29 }
 0x722   : > { %v1241_v31 = vpop.xlane.xlu0 %1240 }
 0x725   : > { %v2669_v36 = vpop.eup %2668 }
 0x726   : > { %v1150_v37 = vmul.f32 %v2669_v36, %v2659_v14  ;;  %v1153_v38 = vpop.permute.xlu2 %1152 }
 0x727   : > { %1180 = vmatpush.msra.mxu2 %v1153_v38 }
 0x728   : > { %2325 = vmatmul.msk.f32.vlgmr.msra.gmra.mxu2 %vm394_vm14, %v1150_v37 }
 0x729   : > { %1323 = vmatpush.bf16.msrb.mxu2 %v2541_v33  ;;  %v2394_v33 = vld [vmem:[%s3755_s5 + $0x60] sm:$0xf] }
 0x72a   : > { %v1147_v42 = vpop.xlane.xlu0 %1146 }
 0x72b   : > { %2670 = vrcp.f32 %v1147_v42 }
 0x72c   : > { %2672 = vrcp.f32 %v1241_v31 }
 0x72d   : > { %1324 = vmatpush.bf16.msrb.mxu2 %v2540_v46  ;;  %v2555_v46 = vld [vmem:[%s3755_s5 + $0x64] sm:$0xf0] }
 0x72e   : > { %v655_v43 = vpop.f32.mrf.mxu0 }
 0x72f   : > { %v766_v45 = vpack.c.bf16 %v3239_v40, %v655_v43 }
 0x731   : > { %v2671_v47 = vpop.eup %2670  ;;  %2284 = vmatmul.msk.bf16.vlgmr.msrb.gmra.mxu0 %vm358_vm11, %v766_v45 }
 0x732   : > { %v1151_v48 = vmul.f32 %v2671_v47, %v2665_v12  ;;  %v2673_v49 = vpop.eup %2672 }
 0x733   : > { %v1247_v21 = vmul.f32 %v2673_v49, %v2661_v19 }
 0x734   : > { %2326 = vmatmul.msk.f32.gmra.mxu2 %vm394_vm14, %v1151_v48 }
 0x73d   : > { %v1252_v50 = vpop.permute.xlu0 %1251 }
 0x73e   : > { %2331 = vmatpush.msk.msra.mxu1 %vm424_vm12, %v1252_v50 }
 0x740   : > { %1277 = vmatpush.msra.mxu1 %v1250_v24 }
 0x741   : > { %2285 = vmatmul.msk.bf16.gmra.mxu0 %vm358_vm11, %v767_v52  ;;  %2332 = vmatmul.msk.f32.vlgmr.msra.gmra.mxu1 %vm394_vm14, %v1247_v21  ;;  %v2402_v21 = vld [vmem:[%s3755_s5 + $0x70] sm:$0xf]  ;;  %v2557_v52 = vld [vmem:[%s3755_s5 + $0x74] sm:$0xf0] }
 0x751   : > { %2318 = vmatmul.msk.bf16.vlgmr.msra.gmra.mxu0 %vm358_vm11, %v1046_v53 }
 0x75f   : > { %v1244_v40 = vpop.xlane.xlu2 %1243 }
 0x760   : > { %2674 = vrcp.f32 %v1244_v40  ;;  %v2556_v40 = vld [vmem:[%s3755_s5 + $0x74] sm:$0xf] }
 0x761   : > { %2319 = vmatmul.msk.bf16.gmra.mxu0 %vm358_vm11, %v1047_v54  ;;  %v2403_v54 = vor.u32 %v2557_v52, %v2402_v21 }
 0x763   : > { %1522 = vmatpush.bf16.msrb.mxu0 %v2403_v54 }
 0x766   : > { %v2675_v57 = vpop.eup %2674 }
 0x767   : > { %v1248_v23 = vmul.f32 %v2675_v57, %v2667_v20  ;;  %v2404_v57 = vld [vmem:[%s3755_s5 + $0x78] sm:$0xf0] }
 0x769   : > { %2333 = vmatmul.msk.f32.gmra.mxu1 %vm394_vm14, %v1248_v23  ;;  %v2407_v23 = vor.u32 %v2556_v40, %v2404_v57 }
 0x76b   : > { %1540 = vmatpush.bf16.msra.mxu3 %v2407_v23 }
 0x7ab   : > { %v1182_v56 = vpop.f32.mrf.mxu2 }
 0x7ae   : > { %v799_v51 = vpop.f32.mrf.mxu0 }
 0x7af   : > { %v836_v2 = vadd.f32 %v3241_v44, %v799_v51  ;;  %v2554_v51 = vld [vmem:[%s3755_s5 + $0x64] sm:$0xf] }
 0x7b6   : > { %v801_v53 = vpop.f32.mrf.mxu0 }
 0x7b7   : > { %v1185_v41 = vpop.f32.mrf.mxu2  ;;  %v838_v5 = vadd.f32 %v3246_v35, %v801_v53  ;;  %v2602_v35 = vld [vmem:[%s3754_s4] ss:$0 sm:$0xff]  ;;  %v2395_v53 = vor.u32 %v2555_v46, %v2394_v33 }
 0x7b9   : > { %1523 = vmatpush.bf16.msrb.mxu0 %v2395_v53 }
 0x7be   : > { %v804_v58 = vpop.f32.mrf.mxu0  ;;  %v1279_v59 = vpop.f32.mrf.mxu1 }
 0x7bf   : > { %v1287_v61 = vrot.slane %v1279_v59, 7  ;;  %v841_v8 = vadd.f32 %v3248_v34, %v804_v58  ;;  %v2386_v59 = vld [vmem:[%s3755_s5 + $0x50] sm:$0xf] }
 0x7c1   : > { %v1292_v62 = vsel %vm424_vm12, %v1185_v41, %v1287_v61  ;;  %v2552_v41 = vld [vmem:[%s3755_s5 + $0x54] sm:$0xf] }
 0x7c2   : > { %v1293_v63 = vpack.c.bf16 %v1292_v62, %v1182_v56  ;;  %v2396_v56 = vld [vmem:[%s3755_s5 + $0x68] sm:$0xf0] }
 0x7c3   : > { %v2399_v58 = vor.u32 %v2554_v51, %v2396_v56  ;;  %v2697_v56 = vld [vmem:[%s2996_s28] sm:$0xf] }
 0x7c4   : > { %2342 = vmatmul.msk.bf16.vlgmr.msrb.gmra.mxu2 %vm358_vm11, %v1293_v63  ;;  %v2388_v63 = vld [vmem:[%s3755_s5 + $0x58] sm:$0xf0] }
 0x7c5   : > { %1541 = vmatpush.bf16.msra.mxu3 %v2399_v58  ;;  %v1410_v58 = vperm.slane %v2697_v56, 2 }
 0x7c6   : > { %v806_v0 = vpop.f32.mrf.mxu0 }
 0x7c7   : > { %v2391_v0 = vor.u32 %v2552_v41, %v2388_v63  ;;  %v1414_v63 = vperm.slane %v2697_v56, 3 }
 0x7c9   : > { %1542 = vmatpush.bf16.msra.mxu3 %v2391_v0 }
 0x7ce   : > { %v1079_v3 = vpop.f32.mrf.mxu0 }
 0x7cf   : > { %v1088_v4 = vadd.f32 %v1079_v3, %v836_v2  ;;  %v2378_v2 = vld [vmem:[%s3755_s5 + $0x40] sm:$0xf]  ;;  %v2551_v3 = vld [vmem:[%s3755_s5 + $0x44] sm:$0xf0] }
 0x7d6   : > { %v1081_v6 = vpop.f32.mrf.mxu0 }
 0x7d7   : > { %v1089_v7 = vadd.f32 %v1081_v6, %v838_v5  ;;  %v2379_v5 = vor.u32 %v2551_v3, %v2378_v2  ;;  %v2380_v6 = vld [vmem:[%s3755_s5 + $0x48] sm:$0xf0] }
 0x7de   : > { %v1084_v9 = vpop.f32.mrf.mxu0 }
 0x7df   : > { %v1090_v10 = vadd.f32 %v1084_v9, %v841_v8  ;;  %v2370_v8 = vld [vmem:[%s3755_s5 + $0x30] sm:$0xf]  ;;  %v2549_v9 = vld [vmem:[%s3755_s5 + $0x34] sm:$0xf0] }
 0x7e6   : > { %v1086_v15 = vpop.f32.mrf.mxu0  ;;  %v1282_v14 = vpop.f32.mrf.mxu1 }
 0x7e7   : > { %v1288_v28 = vrot.slane %v1282_v14, 7  ;;  %v2371_v15 = vor.u32 %v2549_v9, %v2370_v8  ;;  %v2372_v14 = vld [vmem:[%s3755_s5 + $0x38] sm:$0xf0] }
 0x7e9   : > { %v1289_v11 = vsel %vm424_vm12, %v1287_v61, %v1288_v28  ;;  %v2553_v61 = vld [vmem:[%s3755_s5 + $0x54] sm:$0xf0] }
 0x7ea   : > { %v1294_v19 = vpack.c.bf16 %v1289_v11, %v1289_v11  ;;  %v2387_v62 = vor.u32 %v2553_v61, %v2386_v59  ;;  %v2362_v11 = vld [vmem:[%s3755_s5 + $0x20] sm:$0xf] }
 0x7ec   : > { %2343 = vmatmul.msk.bf16.gmra.mxu2 %vm358_vm11, %v1294_v19  ;;  %1524 = vmatpush.bf16.msrb.mxu0 %v2387_v62  ;;  %v2547_v19 = vld [vmem:[%s3755_s5 + $0x24] sm:$0xf0] }
 0x7f0   : > { %1525 = vmatpush.bf16.msrb.mxu0 %v2379_v5 }
 0x7f4   : > { %1526 = vmatpush.bf16.msrb.mxu0 %v2371_v15 }
 0x847   : > { %v1326_v60 = vpop.f32.mrf.mxu2 }
 0x848   : > { %v1335_v44 = vadd.f32 %v1326_v60, %v1088_v4  ;;  %v2550_v4 = vld [vmem:[%s3755_s5 + $0x44] sm:$0xf] }
 0x849   : > { %v2546_v60 = vld [vmem:[%s3755_s5 + $0x24] sm:$0xf] }
 0x84a   : > { %v1338_v25 = vadd.f32 %v2694_v1, %v1335_v44  ;;  %v2363_v44 = vor.u32 %v2547_v19, %v2362_v11 }
 0x84c   : > { %v3325_v12 = vadd.f32 %v2602_v35, %v1338_v25  ;;  %1527 = vmatpush.bf16.msrb.mxu0 %v2363_v44  ;;  %v2354_v25 = vld [vmem:[%s3755_s5 + $0x10] sm:$0xf]  ;;  %v1436_v44 = vld [vmem:[%s3756_s6] sm:$0x3] }
 0x84e   : > { %1348 = vadd.xlane.f32.xlu1 %v3325_v12 }
 0x84f   : > { %v1328_v34 = vpop.f32.mrf.mxu2 }
 0x850   : > { %v1336_v30 = vadd.f32 %v1328_v34, %v1089_v7  ;;  %v2383_v7 = vor.u32 %v2550_v4, %v2380_v6  ;;  %v2545_v34 = vld [vmem:[%s3755_s5 + $0x14] sm:$0xf0] }
 0x852   : > { %v1339_v18 = vadd.f32 %v2695_v39, %v1336_v30  ;;  %1543 = vmatpush.bf16.msra.mxu3 %v2383_v7  ;;  %v2544_v30 = vld [vmem:[%s3755_s5 + $0x14] sm:$0xf]  ;;  %v2355_v39 = vor.u32 %v2545_v34, %v2354_v25 }
 0x854   : > { %v3328_v16 = vadd.f32 %v2602_v35, %v1339_v18  ;;  %v2356_v18 = vld [vmem:[%s3755_s5 + $0x18] sm:$0xf0]  ;;  %1528 = vmatpush.bf16.msrb.mxu0 %v2355_v39 }
 0x856   : > { %1350 = vadd.xlane.f32.xlu0 %v3328_v16 }
 0x86f   : > { %v1331_v17 = vpop.f32.mrf.mxu2 }
 0x870   : > { %v1337_v20 = vadd.f32 %v1331_v17, %v1090_v10  ;;  %v2548_v10 = vld [vmem:[%s3755_s5 + $0x34] sm:$0xf]  ;;  %v2346_v17 = vld [vmem:[%s3755_s5] sm:$0xf] }
 0x871   : > { %v2375_v28 = vor.u32 %v2548_v10, %v2372_v14 }
 0x872   : > { %v1340_v27 = vadd.f32 %v2696_v26, %v1337_v20  ;;  %v2543_v20 = vld [vmem:[%s3755_s5 + $0x4] sm:$0xf0] }
 0x873   : > { %1544 = vmatpush.bf16.msra.mxu3 %v2375_v28 }
 0x874   : > { %v3331_v22 = vadd.f32 %v2602_v35, %v1340_v27  ;;  %v2364_v35 = vld [vmem:[%s3755_s5 + $0x28] sm:$0xf0]  ;;  %v2359_v27 = vor.u32 %v2544_v30, %v2356_v18  ;;  %v3468_v30 = vperm.slane %v1436_v44, 1 }
 0x875   : > { %v2367_v1 = vor.u32 %v2546_v60, %v2364_v35  ;;  %v3460_v35 = vperm.slane %v1436_v44, 0 }
 0x876   : > { %v1352_v29 = vsel %vm68_vm0, %v3331_v22, 0.0 }
 0x877   : > { %v1333_v55 = vpop.f32.mrf.mxu2  ;;  %1353 = vadd.xlane.f32.xlu2 %v1352_v29  ;;  %1545 = vmatpush.bf16.msra.mxu3 %v2367_v1  ;;  %v2542_v29 = vld [vmem:[%s3755_s5 + $0x4] sm:$0xf] }
 0x878   : > { %v2348_v55 = vld [vmem:[%s3755_s5 + $0x8] sm:$0xf0] }
 0x87b   : > { %1546 = vmatpush.bf16.msra.mxu3 %v2359_v27 }
 0x8c1   : > { %v1349_v31 = vpop.xlane.xlu1 %1348 }
 0x8c2   : > { %v1355_v32 = vmul.f32 %v1349_v31, %v2827_v13 }
 0x8c4   : > { %v3337_v36 = vsub.f32 %v3325_v12, %v1355_v32  ;;  %v2347_v32 = vor.u32 %v2543_v20, %v2346_v17  ;;  %v2565_v20 = vld [vmem:[%s3757_s7 + $0x38] sm:$0xff] }
 0x8c5   : > { %1958 = vmatpush.bf16.msrb.mxu1 %v2565_v20 }
 0x8c6   : > { %v1361_v37 = vmul.f32 %v3337_v36, %v3337_v36  ;;  %1529 = vmatpush.bf16.msrb.mxu0 %v2347_v32 }
 0x8c8   : > { %1364 = vadd.xlane.f32.xlu1 %v1361_v37  ;;  %v2351_v37 = vor.u32 %v2542_v29, %v2348_v55 }
 0x8c9   : > { %v1351_v38 = vpop.xlane.xlu0 %1350 }
 0x8ca   : > { %v1356_v42 = vmul.f32 %v1351_v38, %v2827_v13  ;;  %1547 = vmatpush.bf16.msra.mxu3 %v2351_v37 }
 0x8cc   : > { %v3343_v43 = vsub.f32 %v3328_v16, %v1356_v42 }
 0x8ce   : > { %v1362_v45 = vmul.f32 %v3343_v43, %v3343_v43 }
 0x8d0   : > { %1366 = vadd.xlane.f32.xlu2 %v1362_v45 }
 0x8ea   : > { %v1354_v47 = vpop.xlane.xlu2 %1353 }
 0x8eb   : > { %v1357_v48 = vmul.f32 %v1354_v47, %v2827_v13 }
 0x8ed   : > { %v3349_v49 = vsub.f32 %v3331_v22, %v1357_v48 }
 0x8ef   : > { %v1363_v50 = vmul.f32 %v3349_v49, %v3349_v49 }
 0x8f1   : > { %v1368_v24 = vsel %vm68_vm0, %v1363_v50, 0.0 }
 0x8f2   : > { %1369 = vadd.xlane.f32.xlu0 %v1368_v24 }
 0x93b   : > { %v1365_v26 = vpop.xlane.xlu1 %1364 }
 0x93c   : > { %v1371_v31 = vmul.f32 %v1365_v26, %v2827_v13 }
 0x93e   : > { %v1374_v38 = vadd.f32 1e-05, %v1371_v31 }
 0x940   : > { %2676 = vrsqrt.f32 %v1374_v38  ;;  %vm1383_vm2 = vweird.f32 %v1374_v38 }
 0x943   : > { %v1367_v42 = vpop.xlane.xlu2 %1366 }
 0x944   : > { %v1372_v45 = vmul.f32 %v1367_v42, %v2827_v13 }
 0x946   : > { %v2677_v47 = vpop.eup %2676  ;;  %v1375_v48 = vadd.f32 1e-05, %v1372_v45 }
 0x947   : > { %v1378_v50 = vmul.f32 %v2677_v47, %v1374_v38  ;;  %vm1384_vm1 = vweird.f32 %v2677_v47  ;;  %v2564_v38 = vld [vmem:[%s3757_s7 + $0x30] sm:$0xff] }
 0x948   : > { %2678 = vrsqrt.f32 %v1375_v48  ;;  %vm1385_vm3 = vmor %vm1383_vm2, %vm1384_vm1  ;;  %vm1393_vm5 = vweird.f32 %v1375_v48  ;;  %1959 = vmatpush.bf16.msrb.mxu1 %v2564_v38 }
 0x949   : > { %v1379_v24 = vmul.f32 %v2677_v47, %v1378_v50  ;;  %v2573_v50 = vld [vmem:[%s3757_s7 + $0x78] sm:$0xff] }
 0x94a   : > { %1976 = vmatpush.bf16.msra.mxu2 %v2573_v50 }
 0x94b   : > { %v1380_v21 = vmul.f32 0.5, %v1379_v24 }
 0x94d   : > { %v1381_v52 = vsub.f32 1.5, %v1380_v21 }
 0x94e   : > { %v2679_v40 = vpop.eup %2678 }
 0x94f   : > { %v1382_v54 = vmul.f32 %v2677_v47, %v1381_v52  ;;  %v1388_v57 = vmul.f32 %v2679_v40, %v1375_v48  ;;  %vm1394_vm4 = vweird.f32 %v2679_v40 }
 0x950   : > { %vm1395_vm6 = vmor %vm1393_vm5, %vm1394_vm4 }
 0x951   : > { %v1389_v23 = vmul.f32 %v2679_v40, %v1388_v57  ;;  %v1386_v33 = vsel %vm1385_vm3, %v2677_v47, %v1382_v54 }
 0x952   : > { %v1407_v53 = vmul.f32 %v1386_v33, %v3337_v36 }
 0x953   : > { %v1390_v46 = vmul.f32 0.5, %v1389_v23  ;;  %v2563_v23 = vld [vmem:[%s3757_s7 + $0x28] sm:$0xff] }
 0x954   : > { %v1411_v62 = vmul.f32 %v1410_v58, %v1407_v53  ;;  %1960 = vmatpush.bf16.msrb.mxu1 %v2563_v23 }
 0x955   : > { %v1391_v51 = vsub.f32 1.5, %v1390_v46 }
 0x956   : > { %v1415_v2 = vadd.f32 %v1414_v63, %v1411_v62 }
 0x957   : > { %v1392_v59 = vmul.f32 %v2679_v40, %v1391_v51 }
 0x959   : > { %v1396_v61 = vsel %vm1395_vm6, %v2679_v40, %v1392_v59  ;;  %v2572_v59 = vld [vmem:[%s3757_s7 + $0x70] sm:$0xff] }
 0x95a   : > { %v1408_v41 = vmul.f32 %v1396_v61, %v3343_v43  ;;  %1977 = vmatpush.bf16.msra.mxu2 %v2572_v59 }
 0x95c   : > { %v1412_v0 = vmul.f32 %v1410_v58, %v1408_v41 }
 0x95e   : > { %v1416_v3 = vadd.f32 %v1414_v63, %v1412_v0 }
 0x960   : > { %v1418_v4 = vpack.c.bf16 %v1416_v3, %v1415_v2 }
 0x962   : > { %1530 = vmatmul.bf16.vlgmr.msrb.gmra.mxu0 %v1418_v4  ;;  %1548 = vmatmul.bf16.vlgmr.msra.gmra.mxu3 %v1418_v4 }
 0x965   : > { %v1370_v5 = vpop.xlane.xlu0 %1369 }
 0x966   : > { %v1373_v6 = vmul.f32 %v1370_v5, %v2827_v13 }
 0x968   : > { %v1376_v36 = vadd.f32 1e-05, %v1373_v6  ;;  %v2562_v6 = vld [vmem:[%s3757_s7 + $0x20] sm:$0xff] }
 0x969   : > { %1961 = vmatpush.bf16.msrb.mxu1 %v2562_v6 }
 0x96a   : > { %2680 = vrsqrt.f32 %v1376_v36  ;;  %vm1403_vm8 = vweird.f32 %v1376_v36 }
 0x970   : > { %v2681_v7 = vpop.eup %2680 }
 0x971   : > { %v1398_v8 = vmul.f32 %v2681_v7, %v1376_v36  ;;  %vm1404_vm7 = vweird.f32 %v2681_v7 }
 0x972   : > { %vm1405_vm9 = vmor %vm1403_vm8, %vm1404_vm7 }
 0x973   : > { %v1399_v9 = vmul.f32 %v2681_v7, %v1398_v8 }
 0x975   : > { %v1400_v10 = vmul.f32 0.5, %v1399_v9 }
 0x977   : > { %v1401_v15 = vsub.f32 1.5, %v1400_v10  ;;  %v2571_v10 = vld [vmem:[%s3757_s7 + $0x68] sm:$0xff] }
 0x978   : > { %1978 = vmatpush.bf16.msra.mxu2 %v2571_v10 }
 0x979   : > { %v1402_v43 = vmul.f32 %v2681_v7, %v1401_v15 }
 0x97b   : > { %v1406_v14 = vsel %vm1405_vm9, %v2681_v7, %v1402_v43 }
 0x97c   : > { %v1409_v28 = vmul.f32 %v1406_v14, %v3349_v49 }
 0x97e   : > { %v1413_v11 = vmul.f32 %v1410_v58, %v1409_v28 }
 0x980   : > { %v1417_v19 = vadd.f32 %v1414_v63, %v1413_v11 }
 0x982   : > { %v1419_v60 = vpack.c.bf16 %v1417_v19, %v1417_v19 }
 0x984   : > { %1535 = vmatmul.bf16.gmra.mxu0 %v1419_v60  ;;  %1553 = vmatmul.bf16.gmra.mxu3 %v1419_v60 }
 0x9df   : > { %v1531_v1 = vpop.f32.mrf.mxu0 }
 0x9e0   : > { %v3463_v25 = vadd.f32 %v1531_v1, %v3460_v35 }
 0x9e2   : > { %v3466_v34 = vmul.f32 0.70710677, %v3463_v25 }
 0x9e4   : > { %v1570_v49 = vmul.f32 %v3466_v34, %v3466_v34 }
 0x9e5   : > { %v1549_v39 = vpop.f32.mrf.mxu3 }
 0x9e6   : > { %v3472_v18 = vmin.f32 %v1570_v49, 16.0  ;;  %v3475_v17 = vadd.f32 %v1549_v39, %v3468_v30  ;;  %v2561_v39 = vld [vmem:[%s3757_s7 + $0x18] sm:$0xff] }
 0x9e7   : > { %v1533_v26 = vpop.f32.mrf.mxu0  ;;  %1962 = vmatpush.bf16.msrb.mxu1 %v2561_v39 }
 0x9e8   : > { %v1572_v27 = vmul.f32 2.1237322e-06, %v3472_v18  ;;  %v1583_v29 = vmul.f32 3.8918573e-05, %v3472_v18  ;;  %v3483_v55 = vadd.f32 %v1533_v26, %v3460_v35  ;;  %v3486_v31 = vmul.f32 0.70710677, %v3475_v17 }
 0x9ea   : > { %v1573_v32 = vadd.f32 0.00028619796, %v1572_v27  ;;  %v1584_v37 = vadd.f32 0.001143296, %v1583_v29  ;;  %v1610_v42 = vmul.f32 %v3486_v31, %v3486_v31  ;;  %v3494_v45 = vmul.f32 0.70710677, %v3483_v55 }
 0x9ec   : > { %v1574_v47 = vmul.f32 %v1573_v32, %v3472_v18  ;;  %v1585_v48 = vmul.f32 %v1584_v37, %v3472_v18  ;;  %v3501_v24 = vmin.f32 %v1610_v42, 16.0  ;;  %v1650_v21 = vmul.f32 %v3494_v45, %v3494_v45  ;;  %v2570_v32 = vld [vmem:[%s3757_s7 + $0x60] sm:$0xff] }
 0x9ed   : > { %v1551_v52 = vpop.f32.mrf.mxu3  ;;  %1979 = vmatpush.bf16.msra.mxu2 %v2570_v32 }
 0x9ee   : > { %v1575_v40 = vadd.f32 0.0036580483, %v1574_v47  ;;  %v1586_v54 = vadd.f32 0.014752088, %v1585_v48  ;;  %v3506_v57 = vadd.f32 %v1551_v52, %v3468_v30  ;;  %v1612_v33 = vmul.f32 2.1237322e-06, %v3501_v24 }
 0x9ef   : > { %v1623_v46 = vmul.f32 3.8918573e-05, %v3501_v24  ;;  %v3513_v51 = vmin.f32 %v1650_v21, 16.0  ;;  %v2560_v52 = vld [vmem:[%s3757_s7 + $0x10] sm:$0xff] }
 0x9f0   : > { %v1576_v53 = vmul.f32 %v1575_v40, %v3472_v18  ;;  %v1587_v56 = vmul.f32 %v1586_v54, %v3472_v18  ;;  %v3518_v58 = vmul.f32 0.70710677, %v3506_v57  ;;  %v1613_v61 = vadd.f32 0.00028619796, %v1612_v33  ;;  %v2569_v33 = vld [vmem:[%s3757_s7 + $0x58] sm:$0xff]  ;;  %1963 = vmatpush.bf16.msrb.mxu1 %v2560_v52 }
 0x9f1   : > { %v1624_v41 = vadd.f32 0.001143296, %v1623_v46  ;;  %v1652_v62 = vmul.f32 2.1237322e-06, %v3513_v51  ;;  %v1663_v0 = vmul.f32 3.8918573e-05, %v3513_v51  ;;  %1980 = vmatpush.bf16.msra.mxu2 %v2569_v33 }
 0x9f2   : > { %v1588_v63 = vadd.f32 0.112945676, %v1587_v56  ;;  %v1690_v2 = vmul.f32 %v3518_v58, %v3518_v58  ;;  %v1614_v3 = vmul.f32 %v1613_v61, %v3501_v24  ;;  %v1577_v36 = vadd.f32 0.05243302, %v1576_v53 }
 0x9f3   : > { %v1625_v4 = vmul.f32 %v1624_v41, %v3501_v24  ;;  %v1653_v5 = vadd.f32 0.00028619796, %v1652_v62  ;;  %v1664_v8 = vadd.f32 0.001143296, %v1663_v0  ;;  %v2559_v41 = vld [vmem:[%s3757_s7 + $0x8] sm:$0xff] }
 0x9f4   : > { %v1589_v7 = vmul.f32 %v1588_v63, %v3472_v18  ;;  %v3533_v9 = vmin.f32 %v1690_v2, 16.0  ;;  %v1615_v15 = vadd.f32 0.0036580483, %v1614_v3  ;;  %v1578_v20 = vmul.f32 %v1577_v36, %v3472_v18  ;;  %v2568_v3 = vld [vmem:[%s3757_s7 + $0x50] sm:$0xff]  ;;  %1964 = vmatpush.bf16.msrb.mxu1 %v2559_v41 }
 0x9f5   : > { %v1626_v43 = vadd.f32 0.014752088, %v1625_v4  ;;  %v1654_v14 = vmul.f32 %v1653_v5, %v3513_v51  ;;  %v1665_v11 = vmul.f32 %v1664_v8, %v3513_v51  ;;  %1981 = vmatpush.bf16.msra.mxu2 %v2568_v3 }
 0x9f6   : > { %v1590_v28 = vadd.f32 0.4994258, %v1589_v7  ;;  %v1692_v19 = vmul.f32 2.1237322e-06, %v3533_v9  ;;  %v1616_v60 = vmul.f32 %v1615_v15, %v3501_v24  ;;  %v1703_v49 = vmul.f32 3.8918573e-05, %v3533_v9 }
 0x9f7   : > { %v1627_v44 = vmul.f32 %v1626_v43, %v3501_v24  ;;  %v1655_v1 = vadd.f32 0.0036580483, %v1654_v14  ;;  %v1666_v27 = vadd.f32 0.014752088, %v1665_v11  ;;  %v1579_v54 = vadd.f32 0.18741608, %v1578_v20 }
 0x9f8   : > { %v1591_v26 = vmul.f32 %v1590_v28, %v3472_v18  ;;  %v1693_v29 = vadd.f32 0.00028619796, %v1692_v19  ;;  %v1617_v37 = vadd.f32 0.05243302, %v1616_v60  ;;  %v1704_v47 = vadd.f32 0.001143296, %v1703_v49 }
 0x9f9   : > { %v1628_v38 = vadd.f32 0.112945676, %v1627_v44  ;;  %v1656_v42 = vmul.f32 %v1655_v1, %v3513_v51  ;;  %v1667_v50 = vmul.f32 %v1666_v27, %v3513_v51  ;;  %v1580_v63 = vmul.f32 %v1579_v54, %v3472_v18  ;;  %v2558_v15 = vld [vmem:[%s3757_s7] sm:$0xff]  ;;  %v2567_v11 = vld [vmem:[%s3757_s7 + $0x48] sm:$0xff] }
 0x9fa   : > { %v3553_v48 = vadd.f32 1.0, %v1591_v26  ;;  %v1694_v21 = vmul.f32 %v1693_v29, %v3533_v9  ;;  %v1705_v23 = vmul.f32 %v1704_v47, %v3533_v9  ;;  %v1618_v46 = vmul.f32 %v1617_v37, %v3501_v24  ;;  %1965 = vmatpush.bf16.msrb.mxu1 %v2558_v15  ;;  %1982 = vmatpush.bf16.msra.mxu2 %v2567_v11 }
 0x9fb   : > { %v1629_v40 = vmul.f32 %v1628_v38, %v3501_v24  ;;  %v1657_v56 = vadd.f32 0.05243302, %v1656_v42  ;;  %v1668_v59 = vadd.f32 0.112945676, %v1667_v50  ;;  %v1581_v14 = vadd.f32 1.1283791, %v1580_v63 }
 0x9fc   : > { %2682 = vrcp.f32 %v3553_v48  ;;  %v1695_v61 = vadd.f32 0.0036580483, %v1694_v21  ;;  %v1706_v2 = vadd.f32 0.014752088, %v1705_v23  ;;  %v1619_v4 = vadd.f32 0.18741608, %v1618_v46 }
 0x9fd   : > { %v1630_v53 = vadd.f32 0.4994258, %v1629_v40  ;;  %v1669_v0 = vmul.f32 %v1668_v59, %v3513_v51  ;;  %v1658_v7 = vmul.f32 %v1657_v56, %v3513_v51  ;;  %v3595_v49 = vmul.f32 0.5, %v3463_v25  ;;  %v2566_v38 = vld [vmem:[%s3757_s7 + $0x40] sm:$0xff] }
 0x9fe   : > { %v1696_v10 = vmul.f32 %v1695_v61, %v3533_v9  ;;  %v1707_v18 = vmul.f32 %v1706_v2, %v3533_v9  ;;  %v1620_v60 = vmul.f32 %v1619_v4, %v3501_v24  ;;  %v1604_v39 = vand.u32 2147483648, %v3553_v48  ;;  %1983 = vmatpush.bf16.msra.mxu2 %v2566_v38 }
 0x9ff   : > { %v1631_v62 = vmul.f32 %v1630_v53, %v3501_v24  ;;  %v1670_v8 = vadd.f32 0.4994258, %v1669_v0  ;;  %v1659_v20 = vadd.f32 0.18741608, %v1658_v7  ;;  %v1602_v24 = vand.u32 2147483647, %v3553_v48 }
 0xa00   : > { %v1708_v1 = vadd.f32 0.112945676, %v1707_v18  ;;  %v1697_v26 = vadd.f32 0.05243302, %v1696_v10  ;;  %v3603_v37 = vmul.f32 0.5, %v3483_v55  ;;  %vm1598_vm11 = vweird.f32 %v3553_v48 }
 0xa01   : > { %v3576_v5 = vadd.f32 1.0, %v1631_v62  ;;  %v1536_v6 = vpop.f32.mrf.mxu0  ;;  %v1671_v44 = vmul.f32 %v1670_v8, %v3513_v51  ;;  %v1621_v50 = vadd.f32 1.1283791, %v1620_v60  ;;  %v1605_v52 = vor.u32 1.1754944e-38, %v1604_v39 }
 0xa02   : > { %v2683_v36 = vpop.eup %2682  ;;  %v3587_v28 = vadd.f32 %v1536_v6, %v3460_v35  ;;  %v1709_v29 = vmul.f32 %v1708_v1, %v3533_v9  ;;  %v1660_v40 = vmul.f32 %v1659_v20, %v3513_v51  ;;  %v1698_v33 = vmul.f32 %v1697_v26, %v3533_v9 }
 0xa03   : > { %v1594_v43 = vmul.f32 %v2683_v36, %v3553_v48  ;;  %2684 = vrcp.f32 %v3576_v5  ;;  %vm1599_vm10 = vweird.f32 %v2683_v36  ;;  %v3598_v27 = vadd.f32 1.0, %v1671_v44 }
 0xa04   : > { %v3606_v25 = vmul.f32 0.70710677, %v3587_v28  ;;  %vm1600_vm13 = vmor %vm1598_vm11, %vm1599_vm10  ;;  %v1710_v46 = vadd.f32 0.4994258, %v1709_v29  ;;  %v1582_v53 = vmul.f32 %v1581_v14, %v3466_v34  ;;  %vm1603_vm14 = vcmp.eq.f32.partialorder %v1602_v24, 8.507059e+37 }
 0xa05   : > { %v1595_v19 = vsub.f32 1.0, %v1594_v43  ;;  %2686 = vrcp.f32 %v3598_v27  ;;  %v1642_v59 = vand.u32 2147483647, %v3576_v5  ;;  %v1622_v51 = vmul.f32 %v1621_v50, %v3486_v31 }
 0xa06   : > { %v1730_v48 = vmul.f32 %v3606_v25, %v3606_v25  ;;  %vm1638_vm15 = vweird.f32 %v3576_v5  ;;  %v1661_v63 = vadd.f32 1.1283791, %v1660_v40  ;;  %v1644_v2 = vand.u32 2147483648, %v3576_v5 }
 0xa07   : > { %v1596_v35 = vmul.f32 %v2683_v36, %v1595_v19  ;;  %v1554_v32 = vpop.f32.mrf.mxu3  ;;  %v1699_v3 = vadd.f32 0.18741608, %v1698_v33  ;;  %vm3639_vm1 = vcmp.eq.f32.partialorder %v1642_v59, 8.507059e+37  ;;  %v1682_v14 = vand.u32 2147483647, %v3598_v27 }
 0xa08   : > { %v3619_v54 = vadd.f32 %v1554_v32, %v3468_v30  ;;  %v1711_v30 = vmul.f32 %v1710_v46, %v3533_v9  ;;  %v3628_v41 = vmin.f32 %v1730_v48, 16.0  ;;  %v1684_v11 = vand.u32 2147483648, %v3598_v27 }
 0xa09   : > { %v3611_v42 = vpop.eup %2684  ;;  %v1597_v47 = vadd.f32 %v2683_v36, %v1596_v35  ;;  %v1538_v21 = vpop.f32.mrf.mxu0  ;;  %v1645_v60 = vor.u32 1.1754944e-38, %v1644_v2  ;;  %v1662_v44 = vmul.f32 %v1661_v63, %v3494_v45  ;;  %v1700_v1 = vmul.f32 %v1699_v3, %v3533_v9 }
 0xa0a   : > { %v1634_v55 = vmul.f32 %v3611_v42, %v3576_v5  ;;  %v3633_v0 = vmul.f32 0.70710677, %v3619_v54  ;;  %v3636_v4 = vadd.f32 1.0, %v1711_v30  ;;  %v1732_v31 = vmul.f32 2.1237322e-06, %v3628_v41 }
 0xa0b   : > { %v1601_v23 = vsel %vm1600_vm13, %v2683_v36, %v1597_v47  ;;  %v2687_v34 = vpop.eup %2686  ;;  %vm1639_vm2 = vweird.f32 %v3611_v42  ;;  %v1743_v15 = vmul.f32 3.8918573e-05, %v3628_v41  ;;  %vm1678_vm4 = vweird.f32 %v3598_v27 }
 0xa0c   : > { %v1635_v56 = vsub.f32 1.0, %v1634_v55  ;;  %v1606_v61 = vsel %vm1603_vm14, %v1605_v52, %v1601_v23  ;;  %v1674_v8 = vmul.f32 %v2687_v34, %v3598_v27  ;;  %v1770_v10 = vmul.f32 %v3633_v0, %v3633_v0  ;;  %vm3658_vm3 = vmor %vm1638_vm15, %vm1639_vm2 }
 0xa0d   : > { %v1607_v36 = vmul.f32 %v1606_v61, %v1582_v53  ;;  %2688 = vrcp.f32 %v3636_v4  ;;  %v1733_v19 = vadd.f32 0.00028619796, %v1732_v31  ;;  %vm1679_vm5 = vweird.f32 %v2687_v34 }
 0xa0e   : > { %v1636_v62 = vmul.f32 %v3611_v42, %v1635_v56  ;;  %v1675_v43 = vsub.f32 1.0, %v1674_v8  ;;  %v3654_v39 = vmin.f32 %v1770_v10, 16.0  ;;  %v1744_v9 = vadd.f32 0.001143296, %v1743_v15  ;;  %vm1680_vm7 = vmor %vm1678_vm4, %vm1679_vm5 }
 0xa0f   : > { %v1556_v6 = vpop.f32.mrf.mxu3  ;;  %v2408_v20 = vclamps-f32 %v1607_v36, 1.0  ;;  %vm1683_vm6 = vcmp.eq.f32.partialorder %v1682_v14, 8.507059e+37  ;;  %v1685_v5 = vor.u32 1.1754944e-38, %v1684_v11  ;;  %v1734_v38 = vmul.f32 %v1733_v19, %v3628_v41 }
 0xa10   : > { %v1637_v18 = vadd.f32 %v3611_v42, %v1636_v62  ;;  %v1676_v35 = vmul.f32 %v2687_v34, %v1675_v43  ;;  %v1772_v45 = vmul.f32 2.1237322e-06, %v3654_v39  ;;  %v1783_v32 = vmul.f32 3.8918573e-05, %v3654_v39 }
 0xa11   : > { %v1701_v50 = vadd.f32 1.1283791, %v1700_v1  ;;  %v1745_v27 = vmul.f32 %v1744_v9, %v3628_v41  ;;  %v1810_v55 = vadd.f32 1.0, %v2408_v20  ;;  %v1722_v46 = vand.u32 2147483647, %v3636_v4 }
 0xa12   : > { %v1641_v29 = vsel %vm3658_vm3, %v3611_v42, %v1637_v18  ;;  %v1677_v24 = vadd.f32 %v2687_v34, %v1676_v35  ;;  %v1773_v21 = vadd.f32 0.00028619796, %v1772_v45  ;;  %v1784_v52 = vadd.f32 0.001143296, %v1783_v32 }
 0xa13   : > { %v2689_v47 = vpop.eup %2688  ;;  %v1646_v42 = vsel %vm3639_vm1, %v1645_v60, %v1641_v29  ;;  %v1746_v53 = vadd.f32 0.014752088, %v1745_v27  ;;  %v1735_v61 = vadd.f32 0.0036580483, %v1734_v38  ;;  %v1724_v63 = vand.u32 2147483648, %v3636_v4 }
 0xa14   : > { %v1681_v40 = vsel %vm1680_vm7, %v2687_v34, %v1677_v24  ;;  %v1714_v23 = vmul.f32 %v2689_v47, %v3636_v4  ;;  %v1774_v48 = vmul.f32 %v1773_v21, %v3654_v39  ;;  %v1785_v30 = vmul.f32 %v1784_v52, %v3654_v39 }
 0xa15   : > { %v1686_v33 = vsel %vm1683_vm6, %v1685_v5, %v1681_v40  ;;  %v1647_v62 = vmul.f32 %v1646_v42, %v1622_v51  ;;  %vm1719_vm8 = vweird.f32 %v2689_v47  ;;  %v1747_v2 = vmul.f32 %v1746_v53, %v3628_v41 }
 0xa16   : > { %v1687_v56 = vmul.f32 %v1686_v33, %v1662_v44  ;;  %v1715_v59 = vsub.f32 1.0, %v1714_v23  ;;  %v1775_v31 = vadd.f32 0.0036580483, %v1774_v48  ;;  %v1786_v6 = vadd.f32 0.014752088, %v1785_v30 }
 0xa17   : > { %v1816_v36 = vmul.f32 %v1810_v55, %v3595_v49  ;;  %v1702_v7 = vmul.f32 %v1701_v50, %v3518_v58  ;;  %vm1718_vm9 = vweird.f32 %v3636_v4  ;;  %v1748_v8 = vadd.f32 0.112945676, %v1747_v2 }
 0xa18   : > { %v2410_v34 = vclamps-f32 %v1687_v56, 1.0  ;;  %v1716_v3 = vmul.f32 %v2689_v47, %v1715_v59  ;;  %v1736_v51 = vmul.f32 %v1735_v61, %v3628_v41  ;;  %v1787_v15 = vmul.f32 %v1786_v6, %v3654_v39  ;;  %vm1720_vm10 = vmor %vm1718_vm9, %vm1719_vm8 }
 0xa19   : > { %v2409_v43 = vclamps-f32 %v1647_v62, 1.0  ;;  %vm1723_vm11 = vcmp.eq.f32.partialorder %v1722_v46, 8.507059e+37  ;;  %v1725_v14 = vor.u32 1.1754944e-38, %v1724_v63  ;;  %v1749_v11 = vmul.f32 %v1748_v8, %v3628_v41 }
 0xa1a   : > { %v1812_v10 = vadd.f32 1.0, %v2410_v34  ;;  %v1717_v18 = vadd.f32 %v2689_v47, %v1716_v3  ;;  %v1776_v58 = vmul.f32 %v1775_v31, %v3654_v39  ;;  %v1788_v4 = vadd.f32 0.112945676, %v1787_v15 }
 0xa1b   : > { %v1750_v44 = vadd.f32 0.4994258, %v1749_v11  ;;  %v1737_v26 = vadd.f32 0.05243302, %v1736_v51  ;;  %v1811_v45 = vadd.f32 1.0, %v2409_v43  ;;  %v1561_v38 = vmul.f32 0.5, %v3506_v57 }
 0xa1c   : > { %v1818_v49 = vmul.f32 %v1812_v10, %v3603_v37  ;;  %v1721_v19 = vsel %vm1720_vm10, %v2689_v47, %v1717_v18  ;;  %v1789_v35 = vmul.f32 %v1788_v4, %v3654_v39  ;;  %v1777_v32 = vadd.f32 0.05243302, %v1776_v58 }
 0xa1d   : > { %v1726_v60 = vsel %vm1723_vm11, %v1725_v14, %v1721_v19  ;;  %v1751_v29 = vmul.f32 %v1750_v44, %v3628_v41  ;;  %v1559_v37 = vmul.f32 0.5, %v3475_v17  ;;  %v1738_v50 = vmul.f32 %v1737_v26, %v3628_v41 }
 0xa1e   : > { %v1822_v1 = vpack.c.bf16 %v1818_v49, %v1816_v36  ;;  %v1727_v20 = vmul.f32 %v1726_v60, %v1702_v7  ;;  %v1790_v24 = vadd.f32 0.4994258, %v1789_v35  ;;  %v1778_v55 = vmul.f32 %v1777_v32, %v3654_v39 }
 0xa1f   : > { %v1752_v5 = vadd.f32 1.0, %v1751_v29  ;;  %v1817_v27 = vmul.f32 %v1811_v45, %v1559_v37  ;;  %v1739_v23 = vadd.f32 0.18741608, %v1738_v50  ;;  %v1562_v19 = vmul.f32 0.5, %v3587_v28 }
 0xa20   : > { %v2411_v9 = vclamps-f32 %v1727_v20, 1.0  ;;  %1966 = vmatmul.bf16.vlgmr.msrb.gmra.mxu1 %v1822_v1  ;;  %v1791_v21 = vmul.f32 %v1790_v24, %v3654_v39  ;;  %v1779_v33 = vadd.f32 0.18741608, %v1778_v55  ;;  %v1563_v60 = vmul.f32 0.5, %v3619_v54 }
 0xa21   : > { %2690 = vrcp.f32 %v1752_v5  ;;  %v1740_v46 = vmul.f32 %v1739_v23, %v3628_v41  ;;  %v1764_v59 = vand.u32 2147483648, %v1752_v5  ;;  %v1762_v63 = vand.u32 2147483647, %v1752_v5  ;;  %v2581_v23 = vld [vmem:[%s3761_s11 + $0x38] sm:$0xff] (%p54_p0) }
 0xa22   : > { %v1813_v47 = vadd.f32 1.0, %v2411_v9  ;;  %v1792_v42 = vadd.f32 1.0, %v1791_v21  ;;  %v1780_v53 = vmul.f32 %v1779_v33, %v3654_v39  ;;  %vm1758_vm14 = vweird.f32 %v1752_v5  ;;  %2113 = vmatpush.bf16.msra.mxu0 (%p54_p0), %v2581_v23 }
 0xa23   : > { %v1741_v30 = vadd.f32 1.1283791, %v1740_v46  ;;  %v1765_v6 = vor.u32 1.1754944e-38, %v1764_v59  ;;  %vm1763_vm2 = vcmp.eq.f32.partialorder %v1762_v63, 8.507059e+37  ;;  %v2577_v59 = vld [vmem:[%s3761_s11 + $0x18] sm:$0xff] (%p54_p0)  ;;  %vm2126_vm7 = vcmask (%p54_p0), 123904  }
 0xa24   : > { %v1819_v52 = vmul.f32 %v1813_v47, %v1561_v38  ;;  %2692 = vrcp.f32 %v1792_v42  ;;  %v1781_v34 = vadd.f32 1.1283791, %v1780_v53  ;;  %v1804_v31 = vand.u32 2147483648, %v1792_v42  ;;  %v2579_v53 = vld [vmem:[%s3761_s11 + $0x28] sm:$0xff] (%p54_p0) }
 0xa25   : > { %v1802_v41 = vand.u32 2147483647, %v1792_v42  ;;  %v1742_v7 = vmul.f32 %v1741_v30, %v3606_v25  ;;  %vm1798_vm3 = vweird.f32 %v1792_v42  ;;  %v2575_v30 = vld [vmem:[%s3761_s11 + $0x8] sm:$0xff] (%p54_p0) }
 0xa26   : > { %v1823_v40 = vpack.c.bf16 %v1819_v52, %v1817_v27  ;;  %v1805_v51 = vor.u32 1.1754944e-38, %v1804_v31  ;;  %v1782_v15 = vmul.f32 %v1781_v34, %v3633_v0  ;;  %v2603_v0 = vld [vmem:[%s3758_s8] ss:$0 sm:$0xff] }
 0xa27   : > { %v2691_v17 = vpop.eup %2690  ;;  %vm1803_vm5 = vcmp.eq.f32.partialorder %v1802_v41, 8.507059e+37 }
 0xa28   : > { %1984 = vmatmul.bf16.vlgmr.msra.gmra.mxu2 %v1823_v40  ;;  %v1754_v57 = vmul.f32 %v2691_v17, %v1752_v5  ;;  %vm1759_vm13 = vweird.f32 %v2691_v17 }
 0xa29   : > { %vm1760_vm15 = vmor %vm1758_vm14, %vm1759_vm13 }
 0xa2a   : > { %v2693_v48 = vpop.eup %2692  ;;  %v1755_v56 = vsub.f32 1.0, %v1754_v57 }
 0xa2b   : > { %v1794_v61 = vmul.f32 %v2693_v48, %v1792_v42  ;;  %vm1799_vm1 = vweird.f32 %v2693_v48 }
 0xa2c   : > { %v1756_v62 = vmul.f32 %v2691_v17, %v1755_v56  ;;  %vm1800_vm4 = vmor %vm1798_vm3, %vm1799_vm1  ;;  %v2578_v56 = vld [vmem:[%s3761_s11 + $0x20] sm:$0xff] (%p54_p0) }
 0xa2d   : > { %v1795_v2 = vsub.f32 1.0, %v1794_v61  ;;  %v2576_v61 = vld [vmem:[%s3761_s11 + $0x10] sm:$0xff] (%p54_p0) }
 0xa2e   : > { %v1757_v3 = vadd.f32 %v2691_v17, %v1756_v62  ;;  %v2574_v62 = vld [vmem:[%s3761_s11] sm:$0xff] (%p54_p0) }
 0xa2f   : > { %v1796_v36 = vmul.f32 %v2693_v48, %v1795_v2 }
 0xa30   : > { %v1761_v39 = vsel %vm1760_vm15, %v2691_v17, %v1757_v3 }
 0xa31   : > { %v1766_v8 = vsel %vm1763_vm2, %v1765_v6, %v1761_v39  ;;  %v1797_v10 = vadd.f32 %v2693_v48, %v1796_v36  ;;  %v2698_v39 = vld [vmem:[%s3759_s9] ss:$0 sm:$0xff] (%p54_p0)  ;;  %s2135_s9 = sshll.u32 (%p54_p0), %s3763_s13, 4  ;;  %s2136_s9 = int_to_ptr.hbm [resolvable:$true] %s2135_s9 }
 0xa32   : > { %v1767_v18 = vmul.f32 %v1766_v8, %v1742_v7 }
 0xa33   : > { %v1801_v43 = vsel %vm1800_vm4, %v2693_v48, %v1797_v10  ;;  %v2580_v48 = vld [vmem:[%s3761_s11 + $0x30] sm:$0xff] (%p54_p0) }
 0xa34   : > { %v2412_v14 = vclamps-f32 %v1767_v18, 1.0  ;;  %v1806_v11 = vsel %vm1803_vm5, %v1805_v51, %v1801_v43  ;;  %2114 = vmatpush.bf16.msra.mxu0 (%p54_p0), %v2580_v48  ;;  %v2700_v43 = vld [vmem:[%s3762_s12] ss:$0 sm:$0xff] (%p54_p0) }
 0xa35   : > { %v1807_v49 = vmul.f32 %v1806_v11, %v1782_v15 }
 0xa36   : > { %v1814_v58 = vadd.f32 1.0, %v2412_v14 }
 0xa37   : > { %v2413_v4 = vclamps-f32 %v1807_v49, 1.0 }
 0xa38   : > { %v1820_v25 = vmul.f32 %v1814_v58, %v1562_v19  ;;  %2115 = vmatpush.bf16.msra.mxu0 (%p54_p0), %v2579_v53 }
 0xa39   : > { %v1815_v44 = vadd.f32 1.0, %v2413_v4 }
 0xa3a   : > { %v1824_v1 = vpack.c.bf16 %v1820_v25, %v1820_v25 }
 0xa3b   : > { %v1821_v20 = vmul.f32 %v1815_v44, %v1563_v60 }
 0xa3c   : > { %1971 = vmatmul.bf16.gmra.mxu1 %v1824_v1  ;;  %2116 = vmatpush.bf16.msra.mxu0 (%p54_p0), %v2578_v56 }
 0xa3d   : > { %v1825_v26 = vpack.c.bf16 %v1821_v20, %v1821_v20 }
 0xa3f   : > { %1989 = vmatmul.bf16.gmra.mxu2 %v1825_v26 }
 0xa40   :  { %2117 = vmatpush.bf16.msra.mxu0 (%p54_p0), %v2577_v59 }
 0xa44   :  { %2118 = vmatpush.bf16.msra.mxu0 (%p54_p0), %v2576_v61 }
 0xa48   :  { %2119 = vmatpush.bf16.msra.mxu0 (%p54_p0), %v2575_v30 }
 0xa4c   :  { %2120 = vmatpush.bf16.msra.mxu0 (%p54_p0), %v2574_v62 }
 0xa9d   : > { %v1967_v35 = vpop.f32.mrf.mxu1 }
 0xa9e   : > { %v1968_v29 = vadd.f32 %v2603_v0, %v1967_v35 }
 0xaa5   : > { %v1969_v32 = vpop.f32.mrf.mxu1 }
 0xaa6   : > { %v1970_v24 = vadd.f32 %v2603_v0, %v1969_v32 }
 0xaab   : > { %v1985_v45 = vpop.f32.mrf.mxu2 }
 0xaac   : > { %v1986_v9 = vadd.f32 %v1985_v45, %v1968_v29 }
 0xaae   : > { %v1994_v28 = vadd.f32 %v1986_v9, %v3325_v12 }
 0xab0   : > { %1997 = vst [vmem:[#allocation2 + $0x10] sm:$0xff] %v1994_v28 }
 0xab3   : > { %v1987_v54 = vpop.f32.mrf.mxu2 }
 0xab4   : > { %v1988_v37 = vadd.f32 %v1987_v54, %v1970_v24 }
 0xab6   : > { %v1995_v5 = vadd.f32 %v1988_v37, %v3328_v16 }
 0xab7   :  { %v2000_v12 = vld [vmem:[#allocation2 + $0x10] sm:$0xff] (%p54_p0) }
 0xab8   : > { %1998 = vst [vmem:[#allocation2] sm:$0xff] %v1995_v5 }
 0xab9   : > { %v1972_v38 = vpop.f32.mrf.mxu1 }
 0xaba   : > { %v1973_v47 = vadd.f32 %v2603_v0, %v1972_v38 }
 0xabf   :  { %v2001_v42 = vld [vmem:[#allocation2] sm:$0xff] (%p54_p0) }
 0xac0   :  { %v2003_v16 = vsel (%p54_p0), %vm424_vm12, %v2000_v12, %v2001_v42 }
 0xac1   : > { %v1974_v50 = vpop.f32.mrf.mxu1  ;;  %v2007_v40 = vsel (%p54_p0), %vm68_vm0, %v2003_v16, 0.0 }
 0xac2   : > { %v1990_v21 = vpop.f32.mrf.mxu2  ;;  %2008 = vadd.xlane.f32.xlu0 (%p54_p0), %v2007_v40 }
 0xac3   : > { %v1991_v27 = vadd.f32 %v1990_v21, %v1973_v47 }
 0xac5   : > { %v1996_v52 = vadd.f32 %v1991_v27, %v3331_v22 }
 0xac6   :  { %56 = sbr.rel (!%p54_p0) target bundleno = 5 (0x5), region = 80 }
 0xac7   : > { %1999 = vst [vmem:[#allocation2 + $0x8] sm:$0x3] %v1996_v52 }
 0xaca   : > { %v1992_v55 = vpop.f32.mrf.mxu2 }
 0xb35   :  { %v2009_v22 = vpop.xlane.xlu0 %2008 }
 0xb36   :  { %v2017_v33 = vmul.f32 %v2009_v22, %v2827_v13 }
 0xb38   :  { %v2018_v17 = vsub.f32 %v2003_v16, %v2017_v33 }
 0xb3a   :  { %v2019_v46 = vmul.f32 %v2018_v17, %v2018_v17 }
 0xb3c   :  { %v2020_v57 = vsel %vm68_vm0, %v2019_v46, 0.0 }
 0xb3d   :  { %2021 = vadd.xlane.f32.xlu0 %v2020_v57 }
 0xbb0   :  { %v2022_v63 = vpop.xlane.xlu0 %2021 }
 0xbb1   :  { %v2023_v2 = vmul.f32 %v2022_v63, %v2827_v13  ;;  %v2699_v13 = vld [vmem:[%s3760_s10] ss:$0 sm:$0xff] }
 0xbb3   :  { %v2024_v34 = vadd.f32 1e-05, %v2023_v2 }
 0xbb5   :  { %2701 = vrsqrt.f32 %v2024_v34  ;;  %vm2031_vm12 = vweird.f32 %v2024_v34 }
 0xbbb   :  { %v2702_v3 = vpop.eup %2701 }
 0xbbc   :  { %v2026_v31 = vmul.f32 %v2702_v3, %v2024_v34  ;;  %vm2032_vm0 = vweird.f32 %v2702_v3 }
 0xbbd   :  { %vm2033_vm6 = vmor %vm2031_vm12, %vm2032_vm0 }
 0xbbe   :  { %v2027_v6 = vmul.f32 %v2702_v3, %v2026_v31 }
 0xbc0   :  { %v2028_v36 = vmul.f32 0.5, %v2027_v6 }
 0xbc2   :  { %v2029_v41 = vsub.f32 1.5, %v2028_v36 }
 0xbc4   :  { %v2030_v7 = vmul.f32 %v2702_v3, %v2029_v41 }
 0xbc6   :  { %v2034_v8 = vsel %vm2033_vm6, %v2702_v3, %v2030_v7 }
 0xbc7   :  { %v2035_v10 = vmul.f32 %v2034_v8, %v2018_v17 }
 0xbc9   :  { %v2039_v18 = vmul.f32 %v2698_v39, %v2035_v10 }
 0xbcb   :  { %v2043_v51 = vadd.f32 %v2699_v13, %v2039_v18 }
 0xbcd   :  { %v2044_v15 = vpack.c.bf16 %v2043_v51, %v2043_v51 }
 0xbcf   :  { %2121 = vmatmul.bf16.vlgmr.msra.gmra.mxu0 %v2044_v15 }
 0xc4c   :  { %v2122_v14 = vpop.f32.mrf.mxu0 }
 0xc4d   :  { %v2123_v11 = vadd.f32 %v2700_v43, %v2122_v14 }
 0xc4f   :  { %2127 = vst.msk [vmem:[#allocation3] sm:$0x3] %vm2126_vm7, %v2123_v11 }
 0xc50   :  { %2138 = dma.vmem_to_hbm [thread:$0]  %s2134_s15, 32, %s2136_s9, [#allocation4]  }
 0xc54   :  { %v2124_v49 = vpop.f32.mrf.mxu0 }
 0xc55   :  { %2731 = dma.done.wait [#allocation4], 32  }
 0xc56   :  { %2732 = vsyncadd [#allocation4], 4294967264 }
 0xc57   :  { %2143 = vsyncpa [#allocation4], 1 }

</bundles_post_ra>
